<compile_context>
chip_gen: v6e
topology: v6e:2x2x1
jax: 0.10.0
libtpu: 0.0.40
codegen_flags: <defaults>
</compile_context>

<pallas_src>
import functools

import jax
import jax.numpy as jnp
from jax.experimental import pallas as pl
from jax.experimental.pallas import tpu as pltpu

N_IN, H1, H2, N_OUT = 2, 16, 8, 1
LANES = 128
SUBLANES = 8


def mlp_kernel(x_ref, w1_ref, b1_ref, w2_ref, b2_ref, w3_ref, b3_ref, o_ref,
               *, block_rows):
    # Pull every weight/bias out of SMEM once (loop-invariant scalars); each
    # FMA below is then a scalar-operand VPU op — zero broadcast cost.
    w1 = [[w1_ref[o, i] for i in range(N_IN)] for o in range(H1)]
    b1 = [b1_ref[o] for o in range(H1)]
    w2 = [[w2_ref[o, i] for i in range(H1)] for o in range(H2)]
    b2 = [b2_ref[o] for o in range(H2)]
    w3 = [w3_ref[0, i] for i in range(H2)]
    b3 = b3_ref[0]

    def chunk(r, carry):
        row = pl.multiple_of(r * SUBLANES, SUBLANES)
        # One (8, 128) vreg plane per input feature.
        x0 = x_ref[0, pl.ds(row, SUBLANES), :]
        x1 = x_ref[1, pl.ds(row, SUBLANES), :]
        # Layer 1: Linear(2 -> 16) + ReLU
        h1 = [jnp.maximum(w1[o][0] * x0 + w1[o][1] * x1 + b1[o], 0.0)
              for o in range(H1)]
        # Layer 2: Linear(16 -> 8) + ReLU
        h2 = []
        for o in range(H2):
            acc = w2[o][0] * h1[0] + b2[o]
            for i in range(1, H1):
                acc = acc + w2[o][i] * h1[i]
            h2.append(jnp.maximum(acc, 0.0))
        # Layer 3: Linear(8 -> 1) + Sigmoid
        z = w3[0] * h2[0] + b3
        for i in range(1, H2):
            z = z + w3[i] * h2[i]
        # exp rides the EUP slot; reciprocal kept exact so the kernel matches
        # the f32 reference within rounding.
        prob = pl.reciprocal(1.0 + jnp.exp(-z), approx=False)
        o_ref[pl.ds(row, SUBLANES), :] = prob.astype(o_ref.dtype)
        return carry

    jax.lax.fori_loop(0, block_rows // SUBLANES, chunk, 0, unroll=True)


def _round_up(a, b):
    return ((a + b - 1) // b) * b


@functools.partial(jax.jit, static_argnames=("block_rows",))
def binary_moon_forward(x, params, *, block_rows=64):
    """x: (N, 2) float32.  params: PyTorch-layout (out,in) weights, (out,) biases.

    Returns (N, 1) float32 sigmoid probabilities.
    """
    assert block_rows % SUBLANES == 0 and block_rows > 0
    n = x.shape[0]
    w1, b1 = params["w1"], params["b1"]   # (16, 2),  (16,)
    w2, b2 = params["w2"], params["b2"]   # (8, 16),  (8,)
    w3, b3 = params["w3"], params["b3"]   # (1, 8),   (1,)

    # Pack the batch onto sublanes *and* lanes: (2, R, 128) feature planes.
    # Pad only to the row-block granularity (not a mega-tile).
    rows_needed = pl.cdiv(n, LANES)
    tr = min(block_rows, _round_up(max(rows_needed, 1), SUBLANES))
    n_rows = _round_up(rows_needed, tr)
    n_pad = n_rows * LANES
    grid = (n_rows // tr,)

    x_pad = jnp.pad(x.astype(jnp.float32), ((0, n_pad - n), (0, 0)))   # (n_pad, 2)
    x_planes = x_pad.T.reshape(N_IN, n_rows, LANES)                    # (2, R, 128)

    smem = pl.BlockSpec(memory_space=pltpu.MemorySpace.SMEM)
    flops = 2 * (N_IN * H1 + H1 * H2 + H2 * N_OUT) * n_pad
    bytes_accessed = (N_IN * n_pad + n_pad) * 4 + 4 * sum(
        a.size for a in (w1, b1, w2, b2, w3, b3))

    out_planes = pl.pallas_call(
        functools.partial(mlp_kernel, block_rows=tr),
        out_shape=jax.ShapeDtypeStruct((n_rows, LANES), jnp.float32),
        grid=grid,
        in_specs=[
            pl.BlockSpec((N_IN, tr, LANES), lambda i: (0, i, 0)),  # dense batch tile
            smem, smem,                                            # w1, b1 (scalars)
            smem, smem,                                            # w2, b2
            smem, smem,                                            # w3, b3
        ],
        out_specs=pl.BlockSpec((tr, LANES), lambda i: (i, 0)),
        compiler_params=pltpu.CompilerParams(
            dimension_semantics=("parallel",),        # megacore-shard row blocks
            vmem_limit_bytes=32 * 1024 * 1024,
        ),
        cost_estimate=pl.CostEstimate(
            flops=flops,
            transcendentals=n_pad,
            bytes_accessed=bytes_accessed,
        ),
    )(x_planes, w1, b1, w2, b2, w3, b3)

    return out_planes.reshape(n_pad, 1)[:n]                         # (N, 1)


def init_params(key):
    """Deterministic init in PyTorch Linear layout: W (out,in), b (out,)."""
    ks = jax.random.split(key, 6)

    def lin(kw, kb, fan_in, fan_out):
        bound = 1.0 / jnp.sqrt(fan_in)
        w = jax.random.uniform(kw, (fan_out, fan_in), jnp.float32, -bound, bound)
        b = jax.random.uniform(kb, (fan_out,), jnp.float32, -bound, bound)
        return w, b

    w1, b1 = lin(ks[0], ks[1], 2, 16)
    w2, b2 = lin(ks[2], ks[3], 16, 8)
    w3, b3 = lin(ks[4], ks[5], 8, 1)
    return {"w1": w1, "b1": b1, "w2": w2, "b2": b2, "w3": w3, "b3": b3}


def reference_forward(x, p):
    h1 = jnp.maximum(x @ p["w1"].T + p["b1"], 0.0)
    h2 = jnp.maximum(h1 @ p["w2"].T + p["b2"], 0.0)
    return jax.nn.sigmoid(h2 @ p["w3"].T + p["b3"])


if __name__ == "__main__":
    key = jax.random.PRNGKey(0)
    kx, kp, kx2 = jax.random.split(key, 3)
    params = init_params(kp)

    # Small batch of 2-D "moon" points (N=8): exercises the pad-to-one-vreg
    # path with a single grid step.
    x = jax.random.normal(kx, (8, 2), jnp.float32)
    out = binary_moon_forward(x, params)
    jax.block_until_ready(out)
    ref = reference_forward(x, params)
    assert out.shape == (8, 1), out.shape
    assert jnp.allclose(out, ref, atol=1e-5, rtol=1e-5), float(jnp.max(jnp.abs(out - ref)))

    # Ragged batch with a small row block: exercises a multi-step grid, the
    # in-kernel sub-chunk loop and the pad-and-slice tail.
    x2 = jax.random.normal(kx2, (3000, 2), jnp.float32)
    out2 = binary_moon_forward(x2, params, block_rows=16)
    jax.block_until_ready(out2)
    ref2 = reference_forward(x2, params)
    assert out2.shape == (3000, 1), out2.shape
    assert jnp.allclose(out2, ref2, atol=1e-5, rtol=1e-5), float(jnp.max(jnp.abs(out2 - ref2)))

    print("KERNEL_OK")
</pallas_src>

<mosaic_0001>
module attributes {stable_mosaic.version = 11 : i64} {
  func.func @mlp_kernel(%arg0: i32, %arg1: memref<2x8x128xf32, #tpu.memory_space<vmem>>, %arg2: memref<16x2xf32, #tpu.memory_space<smem>>, %arg3: memref<16xf32, #tpu.memory_space<smem>>, %arg4: memref<8x16xf32, #tpu.memory_space<smem>>, %arg5: memref<8xf32, #tpu.memory_space<smem>>, %arg6: memref<1x8xf32, #tpu.memory_space<smem>>, %arg7: memref<1xf32, #tpu.memory_space<smem>>, %arg8: memref<8x128xf32, #tpu.memory_space<vmem>>) attributes {dimension_semantics = [#tpu.dimension_semantics<parallel>], iteration_bounds = array<i64: 1>, scalar_prefetch = 0 : i64, scratch_operands = 0 : i64, tpu.core_type = #tpu.core_type<tc>, window_params = [{transform_indices = @transform_0, window_bounds = array<i64: 2, 8, 128>}, {transform_indices = @transform_1, window_bounds = array<i64: 16, 2>}, {transform_indices = @transform_2, window_bounds = array<i64: 16>}, {transform_indices = @transform_3, window_bounds = array<i64: 8, 16>}, {transform_indices = @transform_4, window_bounds = array<i64: 8>}, {transform_indices = @transform_5, window_bounds = array<i64: 1, 8>}, {transform_indices = @transform_6, window_bounds = array<i64: 1>}, {transform_indices = @transform_7, window_bounds = array<i64: 8, 128>}]} {
    %c0 = arith.constant 0 : index
    %c0_0 = arith.constant 0 : index
    %0 = memref.load %arg2[%c0, %c0_0] : memref<16x2xf32, #tpu.memory_space<smem>>
    %c0_1 = arith.constant 0 : index
    %c1 = arith.constant 1 : index
    %1 = memref.load %arg2[%c0_1, %c1] : memref<16x2xf32, #tpu.memory_space<smem>>
    %c1_2 = arith.constant 1 : index
    %c0_3 = arith.constant 0 : index
    %2 = memref.load %arg2[%c1_2, %c0_3] : memref<16x2xf32, #tpu.memory_space<smem>>
    %c1_4 = arith.constant 1 : index
    %c1_5 = arith.constant 1 : index
    %3 = memref.load %arg2[%c1_4, %c1_5] : memref<16x2xf32, #tpu.memory_space<smem>>
    %c2 = arith.constant 2 : index
    %c0_6 = arith.constant 0 : index
    %4 = memref.load %arg2[%c2, %c0_6] : memref<16x2xf32, #tpu.memory_space<smem>>
    %c2_7 = arith.constant 2 : index
    %c1_8 = arith.constant 1 : index
    %5 = memref.load %arg2[%c2_7, %c1_8] : memref<16x2xf32, #tpu.memory_space<smem>>
    %c3 = arith.constant 3 : index
    %c0_9 = arith.constant 0 : index
    %6 = memref.load %arg2[%c3, %c0_9] : memref<16x2xf32, #tpu.memory_space<smem>>
    %c3_10 = arith.constant 3 : index
    %c1_11 = arith.constant 1 : index
    %7 = memref.load %arg2[%c3_10, %c1_11] : memref<16x2xf32, #tpu.memory_space<smem>>
    %c4 = arith.constant 4 : index
    %c0_12 = arith.constant 0 : index
    %8 = memref.load %arg2[%c4, %c0_12] : memref<16x2xf32, #tpu.memory_space<smem>>
    %c4_13 = arith.constant 4 : index
    %c1_14 = arith.constant 1 : index
    %9 = memref.load %arg2[%c4_13, %c1_14] : memref<16x2xf32, #tpu.memory_space<smem>>
    %c5 = arith.constant 5 : index
    %c0_15 = arith.constant 0 : index
    %10 = memref.load %arg2[%c5, %c0_15] : memref<16x2xf32, #tpu.memory_space<smem>>
    %c5_16 = arith.constant 5 : index
    %c1_17 = arith.constant 1 : index
    %11 = memref.load %arg2[%c5_16, %c1_17] : memref<16x2xf32, #tpu.memory_space<smem>>
    %c6 = arith.constant 6 : index
    %c0_18 = arith.constant 0 : index
    %12 = memref.load %arg2[%c6, %c0_18] : memref<16x2xf32, #tpu.memory_space<smem>>
    %c6_19 = arith.constant 6 : index
    %c1_20 = arith.constant 1 : index
    %13 = memref.load %arg2[%c6_19, %c1_20] : memref<16x2xf32, #tpu.memory_space<smem>>
    %c7 = arith.constant 7 : index
    %c0_21 = arith.constant 0 : index
    %14 = memref.load %arg2[%c7, %c0_21] : memref<16x2xf32, #tpu.memory_space<smem>>
    %c7_22 = arith.constant 7 : index
    %c1_23 = arith.constant 1 : index
    %15 = memref.load %arg2[%c7_22, %c1_23] : memref<16x2xf32, #tpu.memory_space<smem>>
    %c8 = arith.constant 8 : index
    %c0_24 = arith.constant 0 : index
    %16 = memref.load %arg2[%c8, %c0_24] : memref<16x2xf32, #tpu.memory_space<smem>>
    %c8_25 = arith.constant 8 : index
    %c1_26 = arith.constant 1 : index
    %17 = memref.load %arg2[%c8_25, %c1_26] : memref<16x2xf32, #tpu.memory_space<smem>>
    %c9 = arith.constant 9 : index
    %c0_27 = arith.constant 0 : index
    %18 = memref.load %arg2[%c9, %c0_27] : memref<16x2xf32, #tpu.memory_space<smem>>
    %c9_28 = arith.constant 9 : index
    %c1_29 = arith.constant 1 : index
    %19 = memref.load %arg2[%c9_28, %c1_29] : memref<16x2xf32, #tpu.memory_space<smem>>
    %c10 = arith.constant 10 : index
    %c0_30 = arith.constant 0 : index
    %20 = memref.load %arg2[%c10, %c0_30] : memref<16x2xf32, #tpu.memory_space<smem>>
    %c10_31 = arith.constant 10 : index
    %c1_32 = arith.constant 1 : index
    %21 = memref.load %arg2[%c10_31, %c1_32] : memref<16x2xf32, #tpu.memory_space<smem>>
    %c11 = arith.constant 11 : index
    %c0_33 = arith.constant 0 : index
    %22 = memref.load %arg2[%c11, %c0_33] : memref<16x2xf32, #tpu.memory_space<smem>>
    %c11_34 = arith.constant 11 : index
    %c1_35 = arith.constant 1 : index
    %23 = memref.load %arg2[%c11_34, %c1_35] : memref<16x2xf32, #tpu.memory_space<smem>>
    %c12 = arith.constant 12 : index
    %c0_36 = arith.constant 0 : index
    %24 = memref.load %arg2[%c12, %c0_36] : memref<16x2xf32, #tpu.memory_space<smem>>
    %c12_37 = arith.constant 12 : index
    %c1_38 = arith.constant 1 : index
    %25 = memref.load %arg2[%c12_37, %c1_38] : memref<16x2xf32, #tpu.memory_space<smem>>
    %c13 = arith.constant 13 : index
    %c0_39 = arith.constant 0 : index
    %26 = memref.load %arg2[%c13, %c0_39] : memref<16x2xf32, #tpu.memory_space<smem>>
    %c13_40 = arith.constant 13 : index
    %c1_41 = arith.constant 1 : index
    %27 = memref.load %arg2[%c13_40, %c1_41] : memref<16x2xf32, #tpu.memory_space<smem>>
    %c14 = arith.constant 14 : index
    %c0_42 = arith.constant 0 : index
    %28 = memref.load %arg2[%c14, %c0_42] : memref<16x2xf32, #tpu.memory_space<smem>>
    %c14_43 = arith.constant 14 : index
    %c1_44 = arith.constant 1 : index
    %29 = memref.load %arg2[%c14_43, %c1_44] : memref<16x2xf32, #tpu.memory_space<smem>>
    %c15 = arith.constant 15 : index
    %c0_45 = arith.constant 0 : index
    %30 = memref.load %arg2[%c15, %c0_45] : memref<16x2xf32, #tpu.memory_space<smem>>
    %c15_46 = arith.constant 15 : index
    %c1_47 = arith.constant 1 : index
    %31 = memref.load %arg2[%c15_46, %c1_47] : memref<16x2xf32, #tpu.memory_space<smem>>
    %c0_48 = arith.constant 0 : index
    %32 = memref.load %arg3[%c0_48] : memref<16xf32, #tpu.memory_space<smem>>
    %c1_49 = arith.constant 1 : index
    %33 = memref.load %arg3[%c1_49] : memref<16xf32, #tpu.memory_space<smem>>
    %c2_50 = arith.constant 2 : index
    %34 = memref.load %arg3[%c2_50] : memref<16xf32, #tpu.memory_space<smem>>
    %c3_51 = arith.constant 3 : index
    %35 = memref.load %arg3[%c3_51] : memref<16xf32, #tpu.memory_space<smem>>
    %c4_52 = arith.constant 4 : index
    %36 = memref.load %arg3[%c4_52] : memref<16xf32, #tpu.memory_space<smem>>
    %c5_53 = arith.constant 5 : index
    %37 = memref.load %arg3[%c5_53] : memref<16xf32, #tpu.memory_space<smem>>
    %c6_54 = arith.constant 6 : index
    %38 = memref.load %arg3[%c6_54] : memref<16xf32, #tpu.memory_space<smem>>
    %c7_55 = arith.constant 7 : index
    %39 = memref.load %arg3[%c7_55] : memref<16xf32, #tpu.memory_space<smem>>
    %c8_56 = arith.constant 8 : index
    %40 = memref.load %arg3[%c8_56] : memref<16xf32, #tpu.memory_space<smem>>
    %c9_57 = arith.constant 9 : index
    %41 = memref.load %arg3[%c9_57] : memref<16xf32, #tpu.memory_space<smem>>
    %c10_58 = arith.constant 10 : index
    %42 = memref.load %arg3[%c10_58] : memref<16xf32, #tpu.memory_space<smem>>
    %c11_59 = arith.constant 11 : index
    %43 = memref.load %arg3[%c11_59] : memref<16xf32, #tpu.memory_space<smem>>
    %c12_60 = arith.constant 12 : index
    %44 = memref.load %arg3[%c12_60] : memref<16xf32, #tpu.memory_space<smem>>
    %c13_61 = arith.constant 13 : index
    %45 = memref.load %arg3[%c13_61] : memref<16xf32, #tpu.memory_space<smem>>
    %c14_62 = arith.constant 14 : index
    %46 = memref.load %arg3[%c14_62] : memref<16xf32, #tpu.memory_space<smem>>
    %c15_63 = arith.constant 15 : index
    %47 = memref.load %arg3[%c15_63] : memref<16xf32, #tpu.memory_space<smem>>
    %c0_64 = arith.constant 0 : index
    %c0_65 = arith.constant 0 : index
    %48 = memref.load %arg4[%c0_64, %c0_65] : memref<8x16xf32, #tpu.memory_space<smem>>
    %c0_66 = arith.constant 0 : index
    %c1_67 = arith.constant 1 : index
    %49 = memref.load %arg4[%c0_66, %c1_67] : memref<8x16xf32, #tpu.memory_space<smem>>
    %c0_68 = arith.constant 0 : index
    %c2_69 = arith.constant 2 : index
    %50 = memref.load %arg4[%c0_68, %c2_69] : memref<8x16xf32, #tpu.memory_space<smem>>
    %c0_70 = arith.constant 0 : index
    %c3_71 = arith.constant 3 : index
    %51 = memref.load %arg4[%c0_70, %c3_71] : memref<8x16xf32, #tpu.memory_space<smem>>
    %c0_72 = arith.constant 0 : index
    %c4_73 = arith.constant 4 : index
    %52 = memref.load %arg4[%c0_72, %c4_73] : memref<8x16xf32, #tpu.memory_space<smem>>
    %c0_74 = arith.constant 0 : index
    %c5_75 = arith.constant 5 : index
    %53 = memref.load %arg4[%c0_74, %c5_75] : memref<8x16xf32, #tpu.memory_space<smem>>
    %c0_76 = arith.constant 0 : index
    %c6_77 = arith.constant 6 : index
    %54 = memref.load %arg4[%c0_76, %c6_77] : memref<8x16xf32, #tpu.memory_space<smem>>
    %c0_78 = arith.constant 0 : index
    %c7_79 = arith.constant 7 : index
    %55 = memref.load %arg4[%c0_78, %c7_79] : memref<8x16xf32, #tpu.memory_space<smem>>
    %c0_80 = arith.constant 0 : index
    %c8_81 = arith.constant 8 : index
    %56 = memref.load %arg4[%c0_80, %c8_81] : memref<8x16xf32, #tpu.memory_space<smem>>
    %c0_82 = arith.constant 0 : index
    %c9_83 = arith.constant 9 : index
    %57 = memref.load %arg4[%c0_82, %c9_83] : memref<8x16xf32, #tpu.memory_space<smem>>
    %c0_84 = arith.constant 0 : index
    %c10_85 = arith.constant 10 : index
    %58 = memref.load %arg4[%c0_84, %c10_85] : memref<8x16xf32, #tpu.memory_space<smem>>
    %c0_86 = arith.constant 0 : index
    %c11_87 = arith.constant 11 : index
    %59 = memref.load %arg4[%c0_86, %c11_87] : memref<8x16xf32, #tpu.memory_space<smem>>
    %c0_88 = arith.constant 0 : index
    %c12_89 = arith.constant 12 : index
    %60 = memref.load %arg4[%c0_88, %c12_89] : memref<8x16xf32, #tpu.memory_space<smem>>
    %c0_90 = arith.constant 0 : index
    %c13_91 = arith.constant 13 : index
    %61 = memref.load %arg4[%c0_90, %c13_91] : memref<8x16xf32, #tpu.memory_space<smem>>
    %c0_92 = arith.constant 0 : index
    %c14_93 = arith.constant 14 : index
    %62 = memref.load %arg4[%c0_92, %c14_93] : memref<8x16xf32, #tpu.memory_space<smem>>
    %c0_94 = arith.constant 0 : index
    %c15_95 = arith.constant 15 : index
    %63 = memref.load %arg4[%c0_94, %c15_95] : memref<8x16xf32, #tpu.memory_space<smem>>
    %c1_96 = arith.constant 1 : index
    %c0_97 = arith.constant 0 : index
    %64 = memref.load %arg4[%c1_96, %c0_97] : memref<8x16xf32, #tpu.memory_space<smem>>
    %c1_98 = arith.constant 1 : index
    %c1_99 = arith.constant 1 : index
    %65 = memref.load %arg4[%c1_98, %c1_99] : memref<8x16xf32, #tpu.memory_space<smem>>
    %c1_100 = arith.constant 1 : index
    %c2_101 = arith.constant 2 : index
    %66 = memref.load %arg4[%c1_100, %c2_101] : memref<8x16xf32, #tpu.memory_space<smem>>
    %c1_102 = arith.constant 1 : index
    %c3_103 = arith.constant 3 : index
    %67 = memref.load %arg4[%c1_102, %c3_103] : memref<8x16xf32, #tpu.memory_space<smem>>
    %c1_104 = arith.constant 1 : index
    %c4_105 = arith.constant 4 : index
    %68 = memref.load %arg4[%c1_104, %c4_105] : memref<8x16xf32, #tpu.memory_space<smem>>
    %c1_106 = arith.constant 1 : index
    %c5_107 = arith.constant 5 : index
    %69 = memref.load %arg4[%c1_106, %c5_107] : memref<8x16xf32, #tpu.memory_space<smem>>
    %c1_108 = arith.constant 1 : index
    %c6_109 = arith.constant 6 : index
    %70 = memref.load %arg4[%c1_108, %c6_109] : memref<8x16xf32, #tpu.memory_space<smem>>
    %c1_110 = arith.constant 1 : index
    %c7_111 = arith.constant 7 : index
    %71 = memref.load %arg4[%c1_110, %c7_111] : memref<8x16xf32, #tpu.memory_space<smem>>
    %c1_112 = arith.constant 1 : index
    %c8_113 = arith.constant 8 : index
    %72 = memref.load %arg4[%c1_112, %c8_113] : memref<8x16xf32, #tpu.memory_space<smem>>
    %c1_114 = arith.constant 1 : index
    %c9_115 = arith.constant 9 : index
    %73 = memref.load %arg4[%c1_114, %c9_115] : memref<8x16xf32, #tpu.memory_space<smem>>
    %c1_116 = arith.constant 1 : index
    %c10_117 = arith.constant 10 : index
    %74 = memref.load %arg4[%c1_116, %c10_117] : memref<8x16xf32, #tpu.memory_space<smem>>
    %c1_118 = arith.constant 1 : index
    %c11_119 = arith.constant 11 : index
    %75 = memref.load %arg4[%c1_118, %c11_119] : memref<8x16xf32, #tpu.memory_space<smem>>
    %c1_120 = arith.constant 1 : index
    %c12_121 = arith.constant 12 : index
    %76 = memref.load %arg4[%c1_120, %c12_121] : memref<8x16xf32, #tpu.memory_space<smem>>
    %c1_122 = arith.constant 1 : index
    %c13_123 = arith.constant 13 : index
    %77 = memref.load %arg4[%c1_122, %c13_123] : memref<8x16xf32, #tpu.memory_space<smem>>
    %c1_124 = arith.constant 1 : index
    %c14_125 = arith.constant 14 : index
    %78 = memref.load %arg4[%c1_124, %c14_125] : memref<8x16xf32, #tpu.memory_space<smem>>
    %c1_126 = arith.constant 1 : index
    %c15_127 = arith.constant 15 : index
    %79 = memref.load %arg4[%c1_126, %c15_127] : memref<8x16xf32, #tpu.memory_space<smem>>
    %c2_128 = arith.constant 2 : index
    %c0_129 = arith.constant 0 : index
    %80 = memref.load %arg4[%c2_128, %c0_129] : memref<8x16xf32, #tpu.memory_space<smem>>
    %c2_130 = arith.constant 2 : index
    %c1_131 = arith.constant 1 : index
    %81 = memref.load %arg4[%c2_130, %c1_131] : memref<8x16xf32, #tpu.memory_space<smem>>
    %c2_132 = arith.constant 2 : index
    %c2_133 = arith.constant 2 : index
    %82 = memref.load %arg4[%c2_132, %c2_133] : memref<8x16xf32, #tpu.memory_space<smem>>
    %c2_134 = arith.constant 2 : index
    %c3_135 = arith.constant 3 : index
    %83 = memref.load %arg4[%c2_134, %c3_135] : memref<8x16xf32, #tpu.memory_space<smem>>
    %c2_136 = arith.constant 2 : index
    %c4_137 = arith.constant 4 : index
    %84 = memref.load %arg4[%c2_136, %c4_137] : memref<8x16xf32, #tpu.memory_space<smem>>
    %c2_138 = arith.constant 2 : index
    %c5_139 = arith.constant 5 : index
    %85 = memref.load %arg4[%c2_138, %c5_139] : memref<8x16xf32, #tpu.memory_space<smem>>
    %c2_140 = arith.constant 2 : index
    %c6_141 = arith.constant 6 : index
    %86 = memref.load %arg4[%c2_140, %c6_141] : memref<8x16xf32, #tpu.memory_space<smem>>
    %c2_142 = arith.constant 2 : index
    %c7_143 = arith.constant 7 : index
    %87 = memref.load %arg4[%c2_142, %c7_143] : memref<8x16xf32, #tpu.memory_space<smem>>
    %c2_144 = arith.constant 2 : index
    %c8_145 = arith.constant 8 : index
    %88 = memref.load %arg4[%c2_144, %c8_145] : memref<8x16xf32, #tpu.memory_space<smem>>
    %c2_146 = arith.constant 2 : index
    %c9_147 = arith.constant 9 : index
    %89 = memref.load %arg4[%c2_146, %c9_147] : memref<8x16xf32, #tpu.memory_space<smem>>
    %c2_148 = arith.constant 2 : index
    %c10_149 = arith.constant 10 : index
    %90 = memref.load %arg4[%c2_148, %c10_149] : memref<8x16xf32, #tpu.memory_space<smem>>
    %c2_150 = arith.constant 2 : index
    %c11_151 = arith.constant 11 : index
    %91 = memref.load %arg4[%c2_150, %c11_151] : memref<8x16xf32, #tpu.memory_space<smem>>
    %c2_152 = arith.constant 2 : index
    %c12_153 = arith.constant 12 : index
    %92 = memref.load %arg4[%c2_152, %c12_153] : memref<8x16xf32, #tpu.memory_space<smem>>
    %c2_154 = arith.constant 2 : index
    %c13_155 = arith.constant 13 : index
    %93 = memref.load %arg4[%c2_154, %c13_155] : memref<8x16xf32, #tpu.memory_space<smem>>
    %c2_156 = arith.constant 2 : index
    %c14_157 = arith.constant 14 : index
    %94 = memref.load %arg4[%c2_156, %c14_157] : memref<8x16xf32, #tpu.memory_space<smem>>
    %c2_158 = arith.constant 2 : index
    %c15_159 = arith.constant 15 : index
    %95 = memref.load %arg4[%c2_158, %c15_159] : memref<8x16xf32, #tpu.memory_space<smem>>
    %c3_160 = arith.constant 3 : index
    %c0_161 = arith.constant 0 : index
    %96 = memref.load %arg4[%c3_160, %c0_161] : memref<8x16xf32, #tpu.memory_space<smem>>
    %c3_162 = arith.constant 3 : index
    %c1_163 = arith.constant 1 : index
    %97 = memref.load %arg4[%c3_162, %c1_163] : memref<8x16xf32, #tpu.memory_space<smem>>
    %c3_164 = arith.constant 3 : index
    %c2_165 = arith.constant 2 : index
    %98 = memref.load %arg4[%c3_164, %c2_165] : memref<8x16xf32, #tpu.memory_space<smem>>
    %c3_166 = arith.constant 3 : index
    %c3_167 = arith.constant 3 : index
    %99 = memref.load %arg4[%c3_166, %c3_167] : memref<8x16xf32, #tpu.memory_space<smem>>
    %c3_168 = arith.constant 3 : index
    %c4_169 = arith.constant 4 : index
    %100 = memref.load %arg4[%c3_168, %c4_169] : memref<8x16xf32, #tpu.memory_space<smem>>
    %c3_170 = arith.constant 3 : index
    %c5_171 = arith.constant 5 : index
    %101 = memref.load %arg4[%c3_170, %c5_171] : memref<8x16xf32, #tpu.memory_space<smem>>
    %c3_172 = arith.constant 3 : index
    %c6_173 = arith.constant 6 : index
    %102 = memref.load %arg4[%c3_172, %c6_173] : memref<8x16xf32, #tpu.memory_space<smem>>
    %c3_174 = arith.constant 3 : index
    %c7_175 = arith.constant 7 : index
    %103 = memref.load %arg4[%c3_174, %c7_175] : memref<8x16xf32, #tpu.memory_space<smem>>
    %c3_176 = arith.constant 3 : index
    %c8_177 = arith.constant 8 : index
    %104 = memref.load %arg4[%c3_176, %c8_177] : memref<8x16xf32, #tpu.memory_space<smem>>
    %c3_178 = arith.constant 3 : index
    %c9_179 = arith.constant 9 : index
    %105 = memref.load %arg4[%c3_178, %c9_179] : memref<8x16xf32, #tpu.memory_space<smem>>
    %c3_180 = arith.constant 3 : index
    %c10_181 = arith.constant 10 : index
    %106 = memref.load %arg4[%c3_180, %c10_181] : memref<8x16xf32, #tpu.memory_space<smem>>
    %c3_182 = arith.constant 3 : index
    %c11_183 = arith.constant 11 : index
    %107 = memref.load %arg4[%c3_182, %c11_183] : memref<8x16xf32, #tpu.memory_space<smem>>
    %c3_184 = arith.constant 3 : index
    %c12_185 = arith.constant 12 : index
    %108 = memref.load %arg4[%c3_184, %c12_185] : memref<8x16xf32, #tpu.memory_space<smem>>
    %c3_186 = arith.constant 3 : index
    %c13_187 = arith.constant 13 : index
    %109 = memref.load %arg4[%c3_186, %c13_187] : memref<8x16xf32, #tpu.memory_space<smem>>
    %c3_188 = arith.constant 3 : index
    %c14_189 = arith.constant 14 : index
    %110 = memref.load %arg4[%c3_188, %c14_189] : memref<8x16xf32, #tpu.memory_space<smem>>
    %c3_190 = arith.constant 3 : index
    %c15_191 = arith.constant 15 : index
    %111 = memref.load %arg4[%c3_190, %c15_191] : memref<8x16xf32, #tpu.memory_space<smem>>
    %c4_192 = arith.constant 4 : index
    %c0_193 = arith.constant 0 : index
    %112 = memref.load %arg4[%c4_192, %c0_193] : memref<8x16xf32, #tpu.memory_space<smem>>
    %c4_194 = arith.constant 4 : index
    %c1_195 = arith.constant 1 : index
    %113 = memref.load %arg4[%c4_194, %c1_195] : memref<8x16xf32, #tpu.memory_space<smem>>
    %c4_196 = arith.constant 4 : index
    %c2_197 = arith.constant 2 : index
    %114 = memref.load %arg4[%c4_196, %c2_197] : memref<8x16xf32, #tpu.memory_space<smem>>
    %c4_198 = arith.constant 4 : index
    %c3_199 = arith.constant 3 : index
    %115 = memref.load %arg4[%c4_198, %c3_199] : memref<8x16xf32, #tpu.memory_space<smem>>
    %c4_200 = arith.constant 4 : index
    %c4_201 = arith.constant 4 : index
    %116 = memref.load %arg4[%c4_200, %c4_201] : memref<8x16xf32, #tpu.memory_space<smem>>
    %c4_202 = arith.constant 4 : index
    %c5_203 = arith.constant 5 : index
    %117 = memref.load %arg4[%c4_202, %c5_203] : memref<8x16xf32, #tpu.memory_space<smem>>
    %c4_204 = arith.constant 4 : index
    %c6_205 = arith.constant 6 : index
    %118 = memref.load %arg4[%c4_204, %c6_205] : memref<8x16xf32, #tpu.memory_space<smem>>
    %c4_206 = arith.constant 4 : index
    %c7_207 = arith.constant 7 : index
    %119 = memref.load %arg4[%c4_206, %c7_207] : memref<8x16xf32, #tpu.memory_space<smem>>
    %c4_208 = arith.constant 4 : index
    %c8_209 = arith.constant 8 : index
    %120 = memref.load %arg4[%c4_208, %c8_209] : memref<8x16xf32, #tpu.memory_space<smem>>
    %c4_210 = arith.constant 4 : index
    %c9_211 = arith.constant 9 : index
    %121 = memref.load %arg4[%c4_210, %c9_211] : memref<8x16xf32, #tpu.memory_space<smem>>
    %c4_212 = arith.constant 4 : index
    %c10_213 = arith.constant 10 : index
    %122 = memref.load %arg4[%c4_212, %c10_213] : memref<8x16xf32, #tpu.memory_space<smem>>
    %c4_214 = arith.constant 4 : index
    %c11_215 = arith.constant 11 : index
    %123 = memref.load %arg4[%c4_214, %c11_215] : memref<8x16xf32, #tpu.memory_space<smem>>
    %c4_216 = arith.constant 4 : index
    %c12_217 = arith.constant 12 : index
    %124 = memref.load %arg4[%c4_216, %c12_217] : memref<8x16xf32, #tpu.memory_space<smem>>
    %c4_218 = arith.constant 4 : index
    %c13_219 = arith.constant 13 : index
    %125 = memref.load %arg4[%c4_218, %c13_219] : memref<8x16xf32, #tpu.memory_space<smem>>
    %c4_220 = arith.constant 4 : index
    %c14_221 = arith.constant 14 : index
    %126 = memref.load %arg4[%c4_220, %c14_221] : memref<8x16xf32, #tpu.memory_space<smem>>
    %c4_222 = arith.constant 4 : index
    %c15_223 = arith.constant 15 : index
    %127 = memref.load %arg4[%c4_222, %c15_223] : memref<8x16xf32, #tpu.memory_space<smem>>
    %c5_224 = arith.constant 5 : index
    %c0_225 = arith.constant 0 : index
    %128 = memref.load %arg4[%c5_224, %c0_225] : memref<8x16xf32, #tpu.memory_space<smem>>
    %c5_226 = arith.constant 5 : index
    %c1_227 = arith.constant 1 : index
    %129 = memref.load %arg4[%c5_226, %c1_227] : memref<8x16xf32, #tpu.memory_space<smem>>
    %c5_228 = arith.constant 5 : index
    %c2_229 = arith.constant 2 : index
    %130 = memref.load %arg4[%c5_228, %c2_229] : memref<8x16xf32, #tpu.memory_space<smem>>
    %c5_230 = arith.constant 5 : index
    %c3_231 = arith.constant 3 : index
    %131 = memref.load %arg4[%c5_230, %c3_231] : memref<8x16xf32, #tpu.memory_space<smem>>
    %c5_232 = arith.constant 5 : index
    %c4_233 = arith.constant 4 : index
    %132 = memref.load %arg4[%c5_232, %c4_233] : memref<8x16xf32, #tpu.memory_space<smem>>
    %c5_234 = arith.constant 5 : index
    %c5_235 = arith.constant 5 : index
    %133 = memref.load %arg4[%c5_234, %c5_235] : memref<8x16xf32, #tpu.memory_space<smem>>
    %c5_236 = arith.constant 5 : index
    %c6_237 = arith.constant 6 : index
    %134 = memref.load %arg4[%c5_236, %c6_237] : memref<8x16xf32, #tpu.memory_space<smem>>
    %c5_238 = arith.constant 5 : index
    %c7_239 = arith.constant 7 : index
    %135 = memref.load %arg4[%c5_238, %c7_239] : memref<8x16xf32, #tpu.memory_space<smem>>
    %c5_240 = arith.constant 5 : index
    %c8_241 = arith.constant 8 : index
    %136 = memref.load %arg4[%c5_240, %c8_241] : memref<8x16xf32, #tpu.memory_space<smem>>
    %c5_242 = arith.constant 5 : index
    %c9_243 = arith.constant 9 : index
    %137 = memref.load %arg4[%c5_242, %c9_243] : memref<8x16xf32, #tpu.memory_space<smem>>
    %c5_244 = arith.constant 5 : index
    %c10_245 = arith.constant 10 : index
    %138 = memref.load %arg4[%c5_244, %c10_245] : memref<8x16xf32, #tpu.memory_space<smem>>
    %c5_246 = arith.constant 5 : index
    %c11_247 = arith.constant 11 : index
    %139 = memref.load %arg4[%c5_246, %c11_247] : memref<8x16xf32, #tpu.memory_space<smem>>
    %c5_248 = arith.constant 5 : index
    %c12_249 = arith.constant 12 : index
    %140 = memref.load %arg4[%c5_248, %c12_249] : memref<8x16xf32, #tpu.memory_space<smem>>
    %c5_250 = arith.constant 5 : index
    %c13_251 = arith.constant 13 : index
    %141 = memref.load %arg4[%c5_250, %c13_251] : memref<8x16xf32, #tpu.memory_space<smem>>
    %c5_252 = arith.constant 5 : index
    %c14_253 = arith.constant 14 : index
    %142 = memref.load %arg4[%c5_252, %c14_253] : memref<8x16xf32, #tpu.memory_space<smem>>
    %c5_254 = arith.constant 5 : index
    %c15_255 = arith.constant 15 : index
    %143 = memref.load %arg4[%c5_254, %c15_255] : memref<8x16xf32, #tpu.memory_space<smem>>
    %c6_256 = arith.constant 6 : index
    %c0_257 = arith.constant 0 : index
    %144 = memref.load %arg4[%c6_256, %c0_257] : memref<8x16xf32, #tpu.memory_space<smem>>
    %c6_258 = arith.constant 6 : index
    %c1_259 = arith.constant 1 : index
    %145 = memref.load %arg4[%c6_258, %c1_259] : memref<8x16xf32, #tpu.memory_space<smem>>
    %c6_260 = arith.constant 6 : index
    %c2_261 = arith.constant 2 : index
    %146 = memref.load %arg4[%c6_260, %c2_261] : memref<8x16xf32, #tpu.memory_space<smem>>
    %c6_262 = arith.constant 6 : index
    %c3_263 = arith.constant 3 : index
    %147 = memref.load %arg4[%c6_262, %c3_263] : memref<8x16xf32, #tpu.memory_space<smem>>
    %c6_264 = arith.constant 6 : index
    %c4_265 = arith.constant 4 : index
    %148 = memref.load %arg4[%c6_264, %c4_265] : memref<8x16xf32, #tpu.memory_space<smem>>
    %c6_266 = arith.constant 6 : index
    %c5_267 = arith.constant 5 : index
    %149 = memref.load %arg4[%c6_266, %c5_267] : memref<8x16xf32, #tpu.memory_space<smem>>
    %c6_268 = arith.constant 6 : index
    %c6_269 = arith.constant 6 : index
    %150 = memref.load %arg4[%c6_268, %c6_269] : memref<8x16xf32, #tpu.memory_space<smem>>
    %c6_270 = arith.constant 6 : index
    %c7_271 = arith.constant 7 : index
    %151 = memref.load %arg4[%c6_270, %c7_271] : memref<8x16xf32, #tpu.memory_space<smem>>
    %c6_272 = arith.constant 6 : index
    %c8_273 = arith.constant 8 : index
    %152 = memref.load %arg4[%c6_272, %c8_273] : memref<8x16xf32, #tpu.memory_space<smem>>
    %c6_274 = arith.constant 6 : index
    %c9_275 = arith.constant 9 : index
    %153 = memref.load %arg4[%c6_274, %c9_275] : memref<8x16xf32, #tpu.memory_space<smem>>
    %c6_276 = arith.constant 6 : index
    %c10_277 = arith.constant 10 : index
    %154 = memref.load %arg4[%c6_276, %c10_277] : memref<8x16xf32, #tpu.memory_space<smem>>
    %c6_278 = arith.constant 6 : index
    %c11_279 = arith.constant 11 : index
    %155 = memref.load %arg4[%c6_278, %c11_279] : memref<8x16xf32, #tpu.memory_space<smem>>
    %c6_280 = arith.constant 6 : index
    %c12_281 = arith.constant 12 : index
    %156 = memref.load %arg4[%c6_280, %c12_281] : memref<8x16xf32, #tpu.memory_space<smem>>
    %c6_282 = arith.constant 6 : index
    %c13_283 = arith.constant 13 : index
    %157 = memref.load %arg4[%c6_282, %c13_283] : memref<8x16xf32, #tpu.memory_space<smem>>
    %c6_284 = arith.constant 6 : index
    %c14_285 = arith.constant 14 : index
    %158 = memref.load %arg4[%c6_284, %c14_285] : memref<8x16xf32, #tpu.memory_space<smem>>
    %c6_286 = arith.constant 6 : index
    %c15_287 = arith.constant 15 : index
    %159 = memref.load %arg4[%c6_286, %c15_287] : memref<8x16xf32, #tpu.memory_space<smem>>
    %c7_288 = arith.constant 7 : index
    %c0_289 = arith.constant 0 : index
    %160 = memref.load %arg4[%c7_288, %c0_289] : memref<8x16xf32, #tpu.memory_space<smem>>
    %c7_290 = arith.constant 7 : index
    %c1_291 = arith.constant 1 : index
    %161 = memref.load %arg4[%c7_290, %c1_291] : memref<8x16xf32, #tpu.memory_space<smem>>
    %c7_292 = arith.constant 7 : index
    %c2_293 = arith.constant 2 : index
    %162 = memref.load %arg4[%c7_292, %c2_293] : memref<8x16xf32, #tpu.memory_space<smem>>
    %c7_294 = arith.constant 7 : index
    %c3_295 = arith.constant 3 : index
    %163 = memref.load %arg4[%c7_294, %c3_295] : memref<8x16xf32, #tpu.memory_space<smem>>
    %c7_296 = arith.constant 7 : index
    %c4_297 = arith.constant 4 : index
    %164 = memref.load %arg4[%c7_296, %c4_297] : memref<8x16xf32, #tpu.memory_space<smem>>
    %c7_298 = arith.constant 7 : index
    %c5_299 = arith.constant 5 : index
    %165 = memref.load %arg4[%c7_298, %c5_299] : memref<8x16xf32, #tpu.memory_space<smem>>
    %c7_300 = arith.constant 7 : index
    %c6_301 = arith.constant 6 : index
    %166 = memref.load %arg4[%c7_300, %c6_301] : memref<8x16xf32, #tpu.memory_space<smem>>
    %c7_302 = arith.constant 7 : index
    %c7_303 = arith.constant 7 : index
    %167 = memref.load %arg4[%c7_302, %c7_303] : memref<8x16xf32, #tpu.memory_space<smem>>
    %c7_304 = arith.constant 7 : index
    %c8_305 = arith.constant 8 : index
    %168 = memref.load %arg4[%c7_304, %c8_305] : memref<8x16xf32, #tpu.memory_space<smem>>
    %c7_306 = arith.constant 7 : index
    %c9_307 = arith.constant 9 : index
    %169 = memref.load %arg4[%c7_306, %c9_307] : memref<8x16xf32, #tpu.memory_space<smem>>
    %c7_308 = arith.constant 7 : index
    %c10_309 = arith.constant 10 : index
    %170 = memref.load %arg4[%c7_308, %c10_309] : memref<8x16xf32, #tpu.memory_space<smem>>
    %c7_310 = arith.constant 7 : index
    %c11_311 = arith.constant 11 : index
    %171 = memref.load %arg4[%c7_310, %c11_311] : memref<8x16xf32, #tpu.memory_space<smem>>
    %c7_312 = arith.constant 7 : index
    %c12_313 = arith.constant 12 : index
    %172 = memref.load %arg4[%c7_312, %c12_313] : memref<8x16xf32, #tpu.memory_space<smem>>
    %c7_314 = arith.constant 7 : index
    %c13_315 = arith.constant 13 : index
    %173 = memref.load %arg4[%c7_314, %c13_315] : memref<8x16xf32, #tpu.memory_space<smem>>
    %c7_316 = arith.constant 7 : index
    %c14_317 = arith.constant 14 : index
    %174 = memref.load %arg4[%c7_316, %c14_317] : memref<8x16xf32, #tpu.memory_space<smem>>
    %c7_318 = arith.constant 7 : index
    %c15_319 = arith.constant 15 : index
    %175 = memref.load %arg4[%c7_318, %c15_319] : memref<8x16xf32, #tpu.memory_space<smem>>
    %c0_320 = arith.constant 0 : index
    %176 = memref.load %arg5[%c0_320] : memref<8xf32, #tpu.memory_space<smem>>
    %c1_321 = arith.constant 1 : index
    %177 = memref.load %arg5[%c1_321] : memref<8xf32, #tpu.memory_space<smem>>
    %c2_322 = arith.constant 2 : index
    %178 = memref.load %arg5[%c2_322] : memref<8xf32, #tpu.memory_space<smem>>
    %c3_323 = arith.constant 3 : index
    %179 = memref.load %arg5[%c3_323] : memref<8xf32, #tpu.memory_space<smem>>
    %c4_324 = arith.constant 4 : index
    %180 = memref.load %arg5[%c4_324] : memref<8xf32, #tpu.memory_space<smem>>
    %c5_325 = arith.constant 5 : index
    %181 = memref.load %arg5[%c5_325] : memref<8xf32, #tpu.memory_space<smem>>
    %c6_326 = arith.constant 6 : index
    %182 = memref.load %arg5[%c6_326] : memref<8xf32, #tpu.memory_space<smem>>
    %c7_327 = arith.constant 7 : index
    %183 = memref.load %arg5[%c7_327] : memref<8xf32, #tpu.memory_space<smem>>
    %c0_328 = arith.constant 0 : index
    %c0_329 = arith.constant 0 : index
    %184 = memref.load %arg6[%c0_328, %c0_329] : memref<1x8xf32, #tpu.memory_space<smem>>
    %c0_330 = arith.constant 0 : index
    %c1_331 = arith.constant 1 : index
    %185 = memref.load %arg6[%c0_330, %c1_331] : memref<1x8xf32, #tpu.memory_space<smem>>
    %c0_332 = arith.constant 0 : index
    %c2_333 = arith.constant 2 : index
    %186 = memref.load %arg6[%c0_332, %c2_333] : memref<1x8xf32, #tpu.memory_space<smem>>
    %c0_334 = arith.constant 0 : index
    %c3_335 = arith.constant 3 : index
    %187 = memref.load %arg6[%c0_334, %c3_335] : memref<1x8xf32, #tpu.memory_space<smem>>
    %c0_336 = arith.constant 0 : index
    %c4_337 = arith.constant 4 : index
    %188 = memref.load %arg6[%c0_336, %c4_337] : memref<1x8xf32, #tpu.memory_space<smem>>
    %c0_338 = arith.constant 0 : index
    %c5_339 = arith.constant 5 : index
    %189 = memref.load %arg6[%c0_338, %c5_339] : memref<1x8xf32, #tpu.memory_space<smem>>
    %c0_340 = arith.constant 0 : index
    %c6_341 = arith.constant 6 : index
    %190 = memref.load %arg6[%c0_340, %c6_341] : memref<1x8xf32, #tpu.memory_space<smem>>
    %c0_342 = arith.constant 0 : index
    %c7_343 = arith.constant 7 : index
    %191 = memref.load %arg6[%c0_342, %c7_343] : memref<1x8xf32, #tpu.memory_space<smem>>
    %c0_344 = arith.constant 0 : index
    %192 = memref.load %arg7[%c0_344] : memref<1xf32, #tpu.memory_space<smem>>
    %c0_i32 = arith.constant 0 : i32
    %c8_i32 = arith.constant 8 : i32
    %193 = arith.muli %c0_i32, %c8_i32 : i32
    %194 = tpu.assume_multiple %193, 8 : i32
    %c0_345 = arith.constant 0 : index
    %195 = arith.index_cast %194 : i32 to index
    %c0_346 = arith.constant 0 : index
    %196 = vector.load %arg1[%c0_345, %195, %c0_346] : memref<2x8x128xf32, #tpu.memory_space<vmem>>, vector<1x8x128xf32>
    %197 = vector.shape_cast %196 : vector<1x8x128xf32> to vector<8x128xf32>
    %c1_347 = arith.constant 1 : index
    %198 = arith.index_cast %194 : i32 to index
    %c0_348 = arith.constant 0 : index
    %199 = vector.load %arg1[%c1_347, %198, %c0_348] : memref<2x8x128xf32, #tpu.memory_space<vmem>>, vector<1x8x128xf32>
    %200 = vector.shape_cast %199 : vector<1x8x128xf32> to vector<8x128xf32>
    %201 = vector.broadcast %0 : f32 to vector<8x128xf32>
    %202 = arith.mulf %201, %197 : vector<8x128xf32>
    %203 = vector.broadcast %1 : f32 to vector<8x128xf32>
    %204 = arith.mulf %203, %200 : vector<8x128xf32>
    %205 = arith.addf %202, %204 : vector<8x128xf32>
    %206 = vector.broadcast %32 : f32 to vector<8x128xf32>
    %207 = arith.addf %205, %206 : vector<8x128xf32>
    %cst = arith.constant 0.000000e+00 : f32
    %208 = vector.broadcast %cst : f32 to vector<8x128xf32>
    %209 = arith.maximumf %207, %208 : vector<8x128xf32>
    %210 = vector.broadcast %2 : f32 to vector<8x128xf32>
    %211 = arith.mulf %210, %197 : vector<8x128xf32>
    %212 = vector.broadcast %3 : f32 to vector<8x128xf32>
    %213 = arith.mulf %212, %200 : vector<8x128xf32>
    %214 = arith.addf %211, %213 : vector<8x128xf32>
    %215 = vector.broadcast %33 : f32 to vector<8x128xf32>
    %216 = arith.addf %214, %215 : vector<8x128xf32>
    %cst_349 = arith.constant 0.000000e+00 : f32
    %217 = vector.broadcast %cst_349 : f32 to vector<8x128xf32>
    %218 = arith.maximumf %216, %217 : vector<8x128xf32>
    %219 = vector.broadcast %4 : f32 to vector<8x128xf32>
    %220 = arith.mulf %219, %197 : vector<8x128xf32>
    %221 = vector.broadcast %5 : f32 to vector<8x128xf32>
    %222 = arith.mulf %221, %200 : vector<8x128xf32>
    %223 = arith.addf %220, %222 : vector<8x128xf32>
    %224 = vector.broadcast %34 : f32 to vector<8x128xf32>
    %225 = arith.addf %223, %224 : vector<8x128xf32>
    %cst_350 = arith.constant 0.000000e+00 : f32
    %226 = vector.broadcast %cst_350 : f32 to vector<8x128xf32>
    %227 = arith.maximumf %225, %226 : vector<8x128xf32>
    %228 = vector.broadcast %6 : f32 to vector<8x128xf32>
    %229 = arith.mulf %228, %197 : vector<8x128xf32>
    %230 = vector.broadcast %7 : f32 to vector<8x128xf32>
    %231 = arith.mulf %230, %200 : vector<8x128xf32>
    %232 = arith.addf %229, %231 : vector<8x128xf32>
    %233 = vector.broadcast %35 : f32 to vector<8x128xf32>
    %234 = arith.addf %232, %233 : vector<8x128xf32>
    %cst_351 = arith.constant 0.000000e+00 : f32
    %235 = vector.broadcast %cst_351 : f32 to vector<8x128xf32>
    %236 = arith.maximumf %234, %235 : vector<8x128xf32>
    %237 = vector.broadcast %8 : f32 to vector<8x128xf32>
    %238 = arith.mulf %237, %197 : vector<8x128xf32>
    %239 = vector.broadcast %9 : f32 to vector<8x128xf32>
    %240 = arith.mulf %239, %200 : vector<8x128xf32>
    %241 = arith.addf %238, %240 : vector<8x128xf32>
    %242 = vector.broadcast %36 : f32 to vector<8x128xf32>
    %243 = arith.addf %241, %242 : vector<8x128xf32>
    %cst_352 = arith.constant 0.000000e+00 : f32
    %244 = vector.broadcast %cst_352 : f32 to vector<8x128xf32>
    %245 = arith.maximumf %243, %244 : vector<8x128xf32>
    %246 = vector.broadcast %10 : f32 to vector<8x128xf32>
    %247 = arith.mulf %246, %197 : vector<8x128xf32>
    %248 = vector.broadcast %11 : f32 to vector<8x128xf32>
    %249 = arith.mulf %248, %200 : vector<8x128xf32>
    %250 = arith.addf %247, %249 : vector<8x128xf32>
    %251 = vector.broadcast %37 : f32 to vector<8x128xf32>
    %252 = arith.addf %250, %251 : vector<8x128xf32>
    %cst_353 = arith.constant 0.000000e+00 : f32
    %253 = vector.broadcast %cst_353 : f32 to vector<8x128xf32>
    %254 = arith.maximumf %252, %253 : vector<8x128xf32>
    %255 = vector.broadcast %12 : f32 to vector<8x128xf32>
    %256 = arith.mulf %255, %197 : vector<8x128xf32>
    %257 = vector.broadcast %13 : f32 to vector<8x128xf32>
    %258 = arith.mulf %257, %200 : vector<8x128xf32>
    %259 = arith.addf %256, %258 : vector<8x128xf32>
    %260 = vector.broadcast %38 : f32 to vector<8x128xf32>
    %261 = arith.addf %259, %260 : vector<8x128xf32>
    %cst_354 = arith.constant 0.000000e+00 : f32
    %262 = vector.broadcast %cst_354 : f32 to vector<8x128xf32>
    %263 = arith.maximumf %261, %262 : vector<8x128xf32>
    %264 = vector.broadcast %14 : f32 to vector<8x128xf32>
    %265 = arith.mulf %264, %197 : vector<8x128xf32>
    %266 = vector.broadcast %15 : f32 to vector<8x128xf32>
    %267 = arith.mulf %266, %200 : vector<8x128xf32>
    %268 = arith.addf %265, %267 : vector<8x128xf32>
    %269 = vector.broadcast %39 : f32 to vector<8x128xf32>
    %270 = arith.addf %268, %269 : vector<8x128xf32>
    %cst_355 = arith.constant 0.000000e+00 : f32
    %271 = vector.broadcast %cst_355 : f32 to vector<8x128xf32>
    %272 = arith.maximumf %270, %271 : vector<8x128xf32>
    %273 = vector.broadcast %16 : f32 to vector<8x128xf32>
    %274 = arith.mulf %273, %197 : vector<8x128xf32>
    %275 = vector.broadcast %17 : f32 to vector<8x128xf32>
    %276 = arith.mulf %275, %200 : vector<8x128xf32>
    %277 = arith.addf %274, %276 : vector<8x128xf32>
    %278 = vector.broadcast %40 : f32 to vector<8x128xf32>
    %279 = arith.addf %277, %278 : vector<8x128xf32>
    %cst_356 = arith.constant 0.000000e+00 : f32
    %280 = vector.broadcast %cst_356 : f32 to vector<8x128xf32>
    %281 = arith.maximumf %279, %280 : vector<8x128xf32>
    %282 = vector.broadcast %18 : f32 to vector<8x128xf32>
    %283 = arith.mulf %282, %197 : vector<8x128xf32>
    %284 = vector.broadcast %19 : f32 to vector<8x128xf32>
    %285 = arith.mulf %284, %200 : vector<8x128xf32>
    %286 = arith.addf %283, %285 : vector<8x128xf32>
    %287 = vector.broadcast %41 : f32 to vector<8x128xf32>
    %288 = arith.addf %286, %287 : vector<8x128xf32>
    %cst_357 = arith.constant 0.000000e+00 : f32
    %289 = vector.broadcast %cst_357 : f32 to vector<8x128xf32>
    %290 = arith.maximumf %288, %289 : vector<8x128xf32>
    %291 = vector.broadcast %20 : f32 to vector<8x128xf32>
    %292 = arith.mulf %291, %197 : vector<8x128xf32>
    %293 = vector.broadcast %21 : f32 to vector<8x128xf32>
    %294 = arith.mulf %293, %200 : vector<8x128xf32>
    %295 = arith.addf %292, %294 : vector<8x128xf32>
    %296 = vector.broadcast %42 : f32 to vector<8x128xf32>
    %297 = arith.addf %295, %296 : vector<8x128xf32>
    %cst_358 = arith.constant 0.000000e+00 : f32
    %298 = vector.broadcast %cst_358 : f32 to vector<8x128xf32>
    %299 = arith.maximumf %297, %298 : vector<8x128xf32>
    %300 = vector.broadcast %22 : f32 to vector<8x128xf32>
    %301 = arith.mulf %300, %197 : vector<8x128xf32>
    %302 = vector.broadcast %23 : f32 to vector<8x128xf32>
    %303 = arith.mulf %302, %200 : vector<8x128xf32>
    %304 = arith.addf %301, %303 : vector<8x128xf32>
    %305 = vector.broadcast %43 : f32 to vector<8x128xf32>
    %306 = arith.addf %304, %305 : vector<8x128xf32>
    %cst_359 = arith.constant 0.000000e+00 : f32
    %307 = vector.broadcast %cst_359 : f32 to vector<8x128xf32>
    %308 = arith.maximumf %306, %307 : vector<8x128xf32>
    %309 = vector.broadcast %24 : f32 to vector<8x128xf32>
    %310 = arith.mulf %309, %197 : vector<8x128xf32>
    %311 = vector.broadcast %25 : f32 to vector<8x128xf32>
    %312 = arith.mulf %311, %200 : vector<8x128xf32>
    %313 = arith.addf %310, %312 : vector<8x128xf32>
    %314 = vector.broadcast %44 : f32 to vector<8x128xf32>
    %315 = arith.addf %313, %314 : vector<8x128xf32>
    %cst_360 = arith.constant 0.000000e+00 : f32
    %316 = vector.broadcast %cst_360 : f32 to vector<8x128xf32>
    %317 = arith.maximumf %315, %316 : vector<8x128xf32>
    %318 = vector.broadcast %26 : f32 to vector<8x128xf32>
    %319 = arith.mulf %318, %197 : vector<8x128xf32>
    %320 = vector.broadcast %27 : f32 to vector<8x128xf32>
    %321 = arith.mulf %320, %200 : vector<8x128xf32>
    %322 = arith.addf %319, %321 : vector<8x128xf32>
    %323 = vector.broadcast %45 : f32 to vector<8x128xf32>
    %324 = arith.addf %322, %323 : vector<8x128xf32>
    %cst_361 = arith.constant 0.000000e+00 : f32
    %325 = vector.broadcast %cst_361 : f32 to vector<8x128xf32>
    %326 = arith.maximumf %324, %325 : vector<8x128xf32>
    %327 = vector.broadcast %28 : f32 to vector<8x128xf32>
    %328 = arith.mulf %327, %197 : vector<8x128xf32>
    %329 = vector.broadcast %29 : f32 to vector<8x128xf32>
    %330 = arith.mulf %329, %200 : vector<8x128xf32>
    %331 = arith.addf %328, %330 : vector<8x128xf32>
    %332 = vector.broadcast %46 : f32 to vector<8x128xf32>
    %333 = arith.addf %331, %332 : vector<8x128xf32>
    %cst_362 = arith.constant 0.000000e+00 : f32
    %334 = vector.broadcast %cst_362 : f32 to vector<8x128xf32>
    %335 = arith.maximumf %333, %334 : vector<8x128xf32>
    %336 = vector.broadcast %30 : f32 to vector<8x128xf32>
    %337 = arith.mulf %336, %197 : vector<8x128xf32>
    %338 = vector.broadcast %31 : f32 to vector<8x128xf32>
    %339 = arith.mulf %338, %200 : vector<8x128xf32>
    %340 = arith.addf %337, %339 : vector<8x128xf32>
    %341 = vector.broadcast %47 : f32 to vector<8x128xf32>
    %342 = arith.addf %340, %341 : vector<8x128xf32>
    %cst_363 = arith.constant 0.000000e+00 : f32
    %343 = vector.broadcast %cst_363 : f32 to vector<8x128xf32>
    %344 = arith.maximumf %342, %343 : vector<8x128xf32>
    %345 = vector.broadcast %48 : f32 to vector<8x128xf32>
    %346 = arith.mulf %345, %209 : vector<8x128xf32>
    %347 = vector.broadcast %176 : f32 to vector<8x128xf32>
    %348 = arith.addf %346, %347 : vector<8x128xf32>
    %349 = vector.broadcast %49 : f32 to vector<8x128xf32>
    %350 = arith.mulf %349, %218 : vector<8x128xf32>
    %351 = arith.addf %348, %350 : vector<8x128xf32>
    %352 = vector.broadcast %50 : f32 to vector<8x128xf32>
    %353 = arith.mulf %352, %227 : vector<8x128xf32>
    %354 = arith.addf %351, %353 : vector<8x128xf32>
    %355 = vector.broadcast %51 : f32 to vector<8x128xf32>
    %356 = arith.mulf %355, %236 : vector<8x128xf32>
    %357 = arith.addf %354, %356 : vector<8x128xf32>
    %358 = vector.broadcast %52 : f32 to vector<8x128xf32>
    %359 = arith.mulf %358, %245 : vector<8x128xf32>
    %360 = arith.addf %357, %359 : vector<8x128xf32>
    %361 = vector.broadcast %53 : f32 to vector<8x128xf32>
    %362 = arith.mulf %361, %254 : vector<8x128xf32>
    %363 = arith.addf %360, %362 : vector<8x128xf32>
    %364 = vector.broadcast %54 : f32 to vector<8x128xf32>
    %365 = arith.mulf %364, %263 : vector<8x128xf32>
    %366 = arith.addf %363, %365 : vector<8x128xf32>
    %367 = vector.broadcast %55 : f32 to vector<8x128xf32>
    %368 = arith.mulf %367, %272 : vector<8x128xf32>
    %369 = arith.addf %366, %368 : vector<8x128xf32>
    %370 = vector.broadcast %56 : f32 to vector<8x128xf32>
    %371 = arith.mulf %370, %281 : vector<8x128xf32>
    %372 = arith.addf %369, %371 : vector<8x128xf32>
    %373 = vector.broadcast %57 : f32 to vector<8x128xf32>
    %374 = arith.mulf %373, %290 : vector<8x128xf32>
    %375 = arith.addf %372, %374 : vector<8x128xf32>
    %376 = vector.broadcast %58 : f32 to vector<8x128xf32>
    %377 = arith.mulf %376, %299 : vector<8x128xf32>
    %378 = arith.addf %375, %377 : vector<8x128xf32>
    %379 = vector.broadcast %59 : f32 to vector<8x128xf32>
    %380 = arith.mulf %379, %308 : vector<8x128xf32>
    %381 = arith.addf %378, %380 : vector<8x128xf32>
    %382 = vector.broadcast %60 : f32 to vector<8x128xf32>
    %383 = arith.mulf %382, %317 : vector<8x128xf32>
    %384 = arith.addf %381, %383 : vector<8x128xf32>
    %385 = vector.broadcast %61 : f32 to vector<8x128xf32>
    %386 = arith.mulf %385, %326 : vector<8x128xf32>
    %387 = arith.addf %384, %386 : vector<8x128xf32>
    %388 = vector.broadcast %62 : f32 to vector<8x128xf32>
    %389 = arith.mulf %388, %335 : vector<8x128xf32>
    %390 = arith.addf %387, %389 : vector<8x128xf32>
    %391 = vector.broadcast %63 : f32 to vector<8x128xf32>
    %392 = arith.mulf %391, %344 : vector<8x128xf32>
    %393 = arith.addf %390, %392 : vector<8x128xf32>
    %cst_364 = arith.constant 0.000000e+00 : f32
    %394 = vector.broadcast %cst_364 : f32 to vector<8x128xf32>
    %395 = arith.maximumf %393, %394 : vector<8x128xf32>
    %396 = vector.broadcast %64 : f32 to vector<8x128xf32>
    %397 = arith.mulf %396, %209 : vector<8x128xf32>
    %398 = vector.broadcast %177 : f32 to vector<8x128xf32>
    %399 = arith.addf %397, %398 : vector<8x128xf32>
    %400 = vector.broadcast %65 : f32 to vector<8x128xf32>
    %401 = arith.mulf %400, %218 : vector<8x128xf32>
    %402 = arith.addf %399, %401 : vector<8x128xf32>
    %403 = vector.broadcast %66 : f32 to vector<8x128xf32>
    %404 = arith.mulf %403, %227 : vector<8x128xf32>
    %405 = arith.addf %402, %404 : vector<8x128xf32>
    %406 = vector.broadcast %67 : f32 to vector<8x128xf32>
    %407 = arith.mulf %406, %236 : vector<8x128xf32>
    %408 = arith.addf %405, %407 : vector<8x128xf32>
    %409 = vector.broadcast %68 : f32 to vector<8x128xf32>
    %410 = arith.mulf %409, %245 : vector<8x128xf32>
    %411 = arith.addf %408, %410 : vector<8x128xf32>
    %412 = vector.broadcast %69 : f32 to vector<8x128xf32>
    %413 = arith.mulf %412, %254 : vector<8x128xf32>
    %414 = arith.addf %411, %413 : vector<8x128xf32>
    %415 = vector.broadcast %70 : f32 to vector<8x128xf32>
    %416 = arith.mulf %415, %263 : vector<8x128xf32>
    %417 = arith.addf %414, %416 : vector<8x128xf32>
    %418 = vector.broadcast %71 : f32 to vector<8x128xf32>
    %419 = arith.mulf %418, %272 : vector<8x128xf32>
    %420 = arith.addf %417, %419 : vector<8x128xf32>
    %421 = vector.broadcast %72 : f32 to vector<8x128xf32>
    %422 = arith.mulf %421, %281 : vector<8x128xf32>
    %423 = arith.addf %420, %422 : vector<8x128xf32>
    %424 = vector.broadcast %73 : f32 to vector<8x128xf32>
    %425 = arith.mulf %424, %290 : vector<8x128xf32>
    %426 = arith.addf %423, %425 : vector<8x128xf32>
    %427 = vector.broadcast %74 : f32 to vector<8x128xf32>
    %428 = arith.mulf %427, %299 : vector<8x128xf32>
    %429 = arith.addf %426, %428 : vector<8x128xf32>
    %430 = vector.broadcast %75 : f32 to vector<8x128xf32>
    %431 = arith.mulf %430, %308 : vector<8x128xf32>
    %432 = arith.addf %429, %431 : vector<8x128xf32>
    %433 = vector.broadcast %76 : f32 to vector<8x128xf32>
    %434 = arith.mulf %433, %317 : vector<8x128xf32>
    %435 = arith.addf %432, %434 : vector<8x128xf32>
    %436 = vector.broadcast %77 : f32 to vector<8x128xf32>
    %437 = arith.mulf %436, %326 : vector<8x128xf32>
    %438 = arith.addf %435, %437 : vector<8x128xf32>
    %439 = vector.broadcast %78 : f32 to vector<8x128xf32>
    %440 = arith.mulf %439, %335 : vector<8x128xf32>
    %441 = arith.addf %438, %440 : vector<8x128xf32>
    %442 = vector.broadcast %79 : f32 to vector<8x128xf32>
    %443 = arith.mulf %442, %344 : vector<8x128xf32>
    %444 = arith.addf %441, %443 : vector<8x128xf32>
    %cst_365 = arith.constant 0.000000e+00 : f32
    %445 = vector.broadcast %cst_365 : f32 to vector<8x128xf32>
    %446 = arith.maximumf %444, %445 : vector<8x128xf32>
    %447 = vector.broadcast %80 : f32 to vector<8x128xf32>
    %448 = arith.mulf %447, %209 : vector<8x128xf32>
    %449 = vector.broadcast %178 : f32 to vector<8x128xf32>
    %450 = arith.addf %448, %449 : vector<8x128xf32>
    %451 = vector.broadcast %81 : f32 to vector<8x128xf32>
    %452 = arith.mulf %451, %218 : vector<8x128xf32>
    %453 = arith.addf %450, %452 : vector<8x128xf32>
    %454 = vector.broadcast %82 : f32 to vector<8x128xf32>
    %455 = arith.mulf %454, %227 : vector<8x128xf32>
    %456 = arith.addf %453, %455 : vector<8x128xf32>
    %457 = vector.broadcast %83 : f32 to vector<8x128xf32>
    %458 = arith.mulf %457, %236 : vector<8x128xf32>
    %459 = arith.addf %456, %458 : vector<8x128xf32>
    %460 = vector.broadcast %84 : f32 to vector<8x128xf32>
    %461 = arith.mulf %460, %245 : vector<8x128xf32>
    %462 = arith.addf %459, %461 : vector<8x128xf32>
    %463 = vector.broadcast %85 : f32 to vector<8x128xf32>
    %464 = arith.mulf %463, %254 : vector<8x128xf32>
    %465 = arith.addf %462, %464 : vector<8x128xf32>
    %466 = vector.broadcast %86 : f32 to vector<8x128xf32>
    %467 = arith.mulf %466, %263 : vector<8x128xf32>
    %468 = arith.addf %465, %467 : vector<8x128xf32>
    %469 = vector.broadcast %87 : f32 to vector<8x128xf32>
    %470 = arith.mulf %469, %272 : vector<8x128xf32>
    %471 = arith.addf %468, %470 : vector<8x128xf32>
    %472 = vector.broadcast %88 : f32 to vector<8x128xf32>
    %473 = arith.mulf %472, %281 : vector<8x128xf32>
    %474 = arith.addf %471, %473 : vector<8x128xf32>
    %475 = vector.broadcast %89 : f32 to vector<8x128xf32>
    %476 = arith.mulf %475, %290 : vector<8x128xf32>
    %477 = arith.addf %474, %476 : vector<8x128xf32>
    %478 = vector.broadcast %90 : f32 to vector<8x128xf32>
    %479 = arith.mulf %478, %299 : vector<8x128xf32>
    %480 = arith.addf %477, %479 : vector<8x128xf32>
    %481 = vector.broadcast %91 : f32 to vector<8x128xf32>
    %482 = arith.mulf %481, %308 : vector<8x128xf32>
    %483 = arith.addf %480, %482 : vector<8x128xf32>
    %484 = vector.broadcast %92 : f32 to vector<8x128xf32>
    %485 = arith.mulf %484, %317 : vector<8x128xf32>
    %486 = arith.addf %483, %485 : vector<8x128xf32>
    %487 = vector.broadcast %93 : f32 to vector<8x128xf32>
    %488 = arith.mulf %487, %326 : vector<8x128xf32>
    %489 = arith.addf %486, %488 : vector<8x128xf32>
    %490 = vector.broadcast %94 : f32 to vector<8x128xf32>
    %491 = arith.mulf %490, %335 : vector<8x128xf32>
    %492 = arith.addf %489, %491 : vector<8x128xf32>
    %493 = vector.broadcast %95 : f32 to vector<8x128xf32>
    %494 = arith.mulf %493, %344 : vector<8x128xf32>
    %495 = arith.addf %492, %494 : vector<8x128xf32>
    %cst_366 = arith.constant 0.000000e+00 : f32
    %496 = vector.broadcast %cst_366 : f32 to vector<8x128xf32>
    %497 = arith.maximumf %495, %496 : vector<8x128xf32>
    %498 = vector.broadcast %96 : f32 to vector<8x128xf32>
    %499 = arith.mulf %498, %209 : vector<8x128xf32>
    %500 = vector.broadcast %179 : f32 to vector<8x128xf32>
    %501 = arith.addf %499, %500 : vector<8x128xf32>
    %502 = vector.broadcast %97 : f32 to vector<8x128xf32>
    %503 = arith.mulf %502, %218 : vector<8x128xf32>
    %504 = arith.addf %501, %503 : vector<8x128xf32>
    %505 = vector.broadcast %98 : f32 to vector<8x128xf32>
    %506 = arith.mulf %505, %227 : vector<8x128xf32>
    %507 = arith.addf %504, %506 : vector<8x128xf32>
    %508 = vector.broadcast %99 : f32 to vector<8x128xf32>
    %509 = arith.mulf %508, %236 : vector<8x128xf32>
    %510 = arith.addf %507, %509 : vector<8x128xf32>
    %511 = vector.broadcast %100 : f32 to vector<8x128xf32>
    %512 = arith.mulf %511, %245 : vector<8x128xf32>
    %513 = arith.addf %510, %512 : vector<8x128xf32>
    %514 = vector.broadcast %101 : f32 to vector<8x128xf32>
    %515 = arith.mulf %514, %254 : vector<8x128xf32>
    %516 = arith.addf %513, %515 : vector<8x128xf32>
    %517 = vector.broadcast %102 : f32 to vector<8x128xf32>
    %518 = arith.mulf %517, %263 : vector<8x128xf32>
    %519 = arith.addf %516, %518 : vector<8x128xf32>
    %520 = vector.broadcast %103 : f32 to vector<8x128xf32>
    %521 = arith.mulf %520, %272 : vector<8x128xf32>
    %522 = arith.addf %519, %521 : vector<8x128xf32>
    %523 = vector.broadcast %104 : f32 to vector<8x128xf32>
    %524 = arith.mulf %523, %281 : vector<8x128xf32>
    %525 = arith.addf %522, %524 : vector<8x128xf32>
    %526 = vector.broadcast %105 : f32 to vector<8x128xf32>
    %527 = arith.mulf %526, %290 : vector<8x128xf32>
    %528 = arith.addf %525, %527 : vector<8x128xf32>
    %529 = vector.broadcast %106 : f32 to vector<8x128xf32>
    %530 = arith.mulf %529, %299 : vector<8x128xf32>
    %531 = arith.addf %528, %530 : vector<8x128xf32>
    %532 = vector.broadcast %107 : f32 to vector<8x128xf32>
    %533 = arith.mulf %532, %308 : vector<8x128xf32>
    %534 = arith.addf %531, %533 : vector<8x128xf32>
    %535 = vector.broadcast %108 : f32 to vector<8x128xf32>
    %536 = arith.mulf %535, %317 : vector<8x128xf32>
    %537 = arith.addf %534, %536 : vector<8x128xf32>
    %538 = vector.broadcast %109 : f32 to vector<8x128xf32>
    %539 = arith.mulf %538, %326 : vector<8x128xf32>
    %540 = arith.addf %537, %539 : vector<8x128xf32>
    %541 = vector.broadcast %110 : f32 to vector<8x128xf32>
    %542 = arith.mulf %541, %335 : vector<8x128xf32>
    %543 = arith.addf %540, %542 : vector<8x128xf32>
    %544 = vector.broadcast %111 : f32 to vector<8x128xf32>
    %545 = arith.mulf %544, %344 : vector<8x128xf32>
    %546 = arith.addf %543, %545 : vector<8x128xf32>
    %cst_367 = arith.constant 0.000000e+00 : f32
    %547 = vector.broadcast %cst_367 : f32 to vector<8x128xf32>
    %548 = arith.maximumf %546, %547 : vector<8x128xf32>
    %549 = vector.broadcast %112 : f32 to vector<8x128xf32>
    %550 = arith.mulf %549, %209 : vector<8x128xf32>
    %551 = vector.broadcast %180 : f32 to vector<8x128xf32>
    %552 = arith.addf %550, %551 : vector<8x128xf32>
    %553 = vector.broadcast %113 : f32 to vector<8x128xf32>
    %554 = arith.mulf %553, %218 : vector<8x128xf32>
    %555 = arith.addf %552, %554 : vector<8x128xf32>
    %556 = vector.broadcast %114 : f32 to vector<8x128xf32>
    %557 = arith.mulf %556, %227 : vector<8x128xf32>
    %558 = arith.addf %555, %557 : vector<8x128xf32>
    %559 = vector.broadcast %115 : f32 to vector<8x128xf32>
    %560 = arith.mulf %559, %236 : vector<8x128xf32>
    %561 = arith.addf %558, %560 : vector<8x128xf32>
    %562 = vector.broadcast %116 : f32 to vector<8x128xf32>
    %563 = arith.mulf %562, %245 : vector<8x128xf32>
    %564 = arith.addf %561, %563 : vector<8x128xf32>
    %565 = vector.broadcast %117 : f32 to vector<8x128xf32>
    %566 = arith.mulf %565, %254 : vector<8x128xf32>
    %567 = arith.addf %564, %566 : vector<8x128xf32>
    %568 = vector.broadcast %118 : f32 to vector<8x128xf32>
    %569 = arith.mulf %568, %263 : vector<8x128xf32>
    %570 = arith.addf %567, %569 : vector<8x128xf32>
    %571 = vector.broadcast %119 : f32 to vector<8x128xf32>
    %572 = arith.mulf %571, %272 : vector<8x128xf32>
    %573 = arith.addf %570, %572 : vector<8x128xf32>
    %574 = vector.broadcast %120 : f32 to vector<8x128xf32>
    %575 = arith.mulf %574, %281 : vector<8x128xf32>
    %576 = arith.addf %573, %575 : vector<8x128xf32>
    %577 = vector.broadcast %121 : f32 to vector<8x128xf32>
    %578 = arith.mulf %577, %290 : vector<8x128xf32>
    %579 = arith.addf %576, %578 : vector<8x128xf32>
    %580 = vector.broadcast %122 : f32 to vector<8x128xf32>
    %581 = arith.mulf %580, %299 : vector<8x128xf32>
    %582 = arith.addf %579, %581 : vector<8x128xf32>
    %583 = vector.broadcast %123 : f32 to vector<8x128xf32>
    %584 = arith.mulf %583, %308 : vector<8x128xf32>
    %585 = arith.addf %582, %584 : vector<8x128xf32>
    %586 = vector.broadcast %124 : f32 to vector<8x128xf32>
    %587 = arith.mulf %586, %317 : vector<8x128xf32>
    %588 = arith.addf %585, %587 : vector<8x128xf32>
    %589 = vector.broadcast %125 : f32 to vector<8x128xf32>
    %590 = arith.mulf %589, %326 : vector<8x128xf32>
    %591 = arith.addf %588, %590 : vector<8x128xf32>
    %592 = vector.broadcast %126 : f32 to vector<8x128xf32>
    %593 = arith.mulf %592, %335 : vector<8x128xf32>
    %594 = arith.addf %591, %593 : vector<8x128xf32>
    %595 = vector.broadcast %127 : f32 to vector<8x128xf32>
    %596 = arith.mulf %595, %344 : vector<8x128xf32>
    %597 = arith.addf %594, %596 : vector<8x128xf32>
    %cst_368 = arith.constant 0.000000e+00 : f32
    %598 = vector.broadcast %cst_368 : f32 to vector<8x128xf32>
    %599 = arith.maximumf %597, %598 : vector<8x128xf32>
    %600 = vector.broadcast %128 : f32 to vector<8x128xf32>
    %601 = arith.mulf %600, %209 : vector<8x128xf32>
    %602 = vector.broadcast %181 : f32 to vector<8x128xf32>
    %603 = arith.addf %601, %602 : vector<8x128xf32>
    %604 = vector.broadcast %129 : f32 to vector<8x128xf32>
    %605 = arith.mulf %604, %218 : vector<8x128xf32>
    %606 = arith.addf %603, %605 : vector<8x128xf32>
    %607 = vector.broadcast %130 : f32 to vector<8x128xf32>
    %608 = arith.mulf %607, %227 : vector<8x128xf32>
    %609 = arith.addf %606, %608 : vector<8x128xf32>
    %610 = vector.broadcast %131 : f32 to vector<8x128xf32>
    %611 = arith.mulf %610, %236 : vector<8x128xf32>
    %612 = arith.addf %609, %611 : vector<8x128xf32>
    %613 = vector.broadcast %132 : f32 to vector<8x128xf32>
    %614 = arith.mulf %613, %245 : vector<8x128xf32>
    %615 = arith.addf %612, %614 : vector<8x128xf32>
    %616 = vector.broadcast %133 : f32 to vector<8x128xf32>
    %617 = arith.mulf %616, %254 : vector<8x128xf32>
    %618 = arith.addf %615, %617 : vector<8x128xf32>
    %619 = vector.broadcast %134 : f32 to vector<8x128xf32>
    %620 = arith.mulf %619, %263 : vector<8x128xf32>
    %621 = arith.addf %618, %620 : vector<8x128xf32>
    %622 = vector.broadcast %135 : f32 to vector<8x128xf32>
    %623 = arith.mulf %622, %272 : vector<8x128xf32>
    %624 = arith.addf %621, %623 : vector<8x128xf32>
    %625 = vector.broadcast %136 : f32 to vector<8x128xf32>
    %626 = arith.mulf %625, %281 : vector<8x128xf32>
    %627 = arith.addf %624, %626 : vector<8x128xf32>
    %628 = vector.broadcast %137 : f32 to vector<8x128xf32>
    %629 = arith.mulf %628, %290 : vector<8x128xf32>
    %630 = arith.addf %627, %629 : vector<8x128xf32>
    %631 = vector.broadcast %138 : f32 to vector<8x128xf32>
    %632 = arith.mulf %631, %299 : vector<8x128xf32>
    %633 = arith.addf %630, %632 : vector<8x128xf32>
    %634 = vector.broadcast %139 : f32 to vector<8x128xf32>
    %635 = arith.mulf %634, %308 : vector<8x128xf32>
    %636 = arith.addf %633, %635 : vector<8x128xf32>
    %637 = vector.broadcast %140 : f32 to vector<8x128xf32>
    %638 = arith.mulf %637, %317 : vector<8x128xf32>
    %639 = arith.addf %636, %638 : vector<8x128xf32>
    %640 = vector.broadcast %141 : f32 to vector<8x128xf32>
    %641 = arith.mulf %640, %326 : vector<8x128xf32>
    %642 = arith.addf %639, %641 : vector<8x128xf32>
    %643 = vector.broadcast %142 : f32 to vector<8x128xf32>
    %644 = arith.mulf %643, %335 : vector<8x128xf32>
    %645 = arith.addf %642, %644 : vector<8x128xf32>
    %646 = vector.broadcast %143 : f32 to vector<8x128xf32>
    %647 = arith.mulf %646, %344 : vector<8x128xf32>
    %648 = arith.addf %645, %647 : vector<8x128xf32>
    %cst_369 = arith.constant 0.000000e+00 : f32
    %649 = vector.broadcast %cst_369 : f32 to vector<8x128xf32>
    %650 = arith.maximumf %648, %649 : vector<8x128xf32>
    %651 = vector.broadcast %144 : f32 to vector<8x128xf32>
    %652 = arith.mulf %651, %209 : vector<8x128xf32>
    %653 = vector.broadcast %182 : f32 to vector<8x128xf32>
    %654 = arith.addf %652, %653 : vector<8x128xf32>
    %655 = vector.broadcast %145 : f32 to vector<8x128xf32>
    %656 = arith.mulf %655, %218 : vector<8x128xf32>
    %657 = arith.addf %654, %656 : vector<8x128xf32>
    %658 = vector.broadcast %146 : f32 to vector<8x128xf32>
    %659 = arith.mulf %658, %227 : vector<8x128xf32>
    %660 = arith.addf %657, %659 : vector<8x128xf32>
    %661 = vector.broadcast %147 : f32 to vector<8x128xf32>
    %662 = arith.mulf %661, %236 : vector<8x128xf32>
    %663 = arith.addf %660, %662 : vector<8x128xf32>
    %664 = vector.broadcast %148 : f32 to vector<8x128xf32>
    %665 = arith.mulf %664, %245 : vector<8x128xf32>
    %666 = arith.addf %663, %665 : vector<8x128xf32>
    %667 = vector.broadcast %149 : f32 to vector<8x128xf32>
    %668 = arith.mulf %667, %254 : vector<8x128xf32>
    %669 = arith.addf %666, %668 : vector<8x128xf32>
    %670 = vector.broadcast %150 : f32 to vector<8x128xf32>
    %671 = arith.mulf %670, %263 : vector<8x128xf32>
    %672 = arith.addf %669, %671 : vector<8x128xf32>
    %673 = vector.broadcast %151 : f32 to vector<8x128xf32>
    %674 = arith.mulf %673, %272 : vector<8x128xf32>
    %675 = arith.addf %672, %674 : vector<8x128xf32>
    %676 = vector.broadcast %152 : f32 to vector<8x128xf32>
    %677 = arith.mulf %676, %281 : vector<8x128xf32>
    %678 = arith.addf %675, %677 : vector<8x128xf32>
    %679 = vector.broadcast %153 : f32 to vector<8x128xf32>
    %680 = arith.mulf %679, %290 : vector<8x128xf32>
    %681 = arith.addf %678, %680 : vector<8x128xf32>
    %682 = vector.broadcast %154 : f32 to vector<8x128xf32>
    %683 = arith.mulf %682, %299 : vector<8x128xf32>
    %684 = arith.addf %681, %683 : vector<8x128xf32>
    %685 = vector.broadcast %155 : f32 to vector<8x128xf32>
    %686 = arith.mulf %685, %308 : vector<8x128xf32>
    %687 = arith.addf %684, %686 : vector<8x128xf32>
    %688 = vector.broadcast %156 : f32 to vector<8x128xf32>
    %689 = arith.mulf %688, %317 : vector<8x128xf32>
    %690 = arith.addf %687, %689 : vector<8x128xf32>
    %691 = vector.broadcast %157 : f32 to vector<8x128xf32>
    %692 = arith.mulf %691, %326 : vector<8x128xf32>
    %693 = arith.addf %690, %692 : vector<8x128xf32>
    %694 = vector.broadcast %158 : f32 to vector<8x128xf32>
    %695 = arith.mulf %694, %335 : vector<8x128xf32>
    %696 = arith.addf %693, %695 : vector<8x128xf32>
    %697 = vector.broadcast %159 : f32 to vector<8x128xf32>
    %698 = arith.mulf %697, %344 : vector<8x128xf32>
    %699 = arith.addf %696, %698 : vector<8x128xf32>
    %cst_370 = arith.constant 0.000000e+00 : f32
    %700 = vector.broadcast %cst_370 : f32 to vector<8x128xf32>
    %701 = arith.maximumf %699, %700 : vector<8x128xf32>
    %702 = vector.broadcast %160 : f32 to vector<8x128xf32>
    %703 = arith.mulf %702, %209 : vector<8x128xf32>
    %704 = vector.broadcast %183 : f32 to vector<8x128xf32>
    %705 = arith.addf %703, %704 : vector<8x128xf32>
    %706 = vector.broadcast %161 : f32 to vector<8x128xf32>
    %707 = arith.mulf %706, %218 : vector<8x128xf32>
    %708 = arith.addf %705, %707 : vector<8x128xf32>
    %709 = vector.broadcast %162 : f32 to vector<8x128xf32>
    %710 = arith.mulf %709, %227 : vector<8x128xf32>
    %711 = arith.addf %708, %710 : vector<8x128xf32>
    %712 = vector.broadcast %163 : f32 to vector<8x128xf32>
    %713 = arith.mulf %712, %236 : vector<8x128xf32>
    %714 = arith.addf %711, %713 : vector<8x128xf32>
    %715 = vector.broadcast %164 : f32 to vector<8x128xf32>
    %716 = arith.mulf %715, %245 : vector<8x128xf32>
    %717 = arith.addf %714, %716 : vector<8x128xf32>
    %718 = vector.broadcast %165 : f32 to vector<8x128xf32>
    %719 = arith.mulf %718, %254 : vector<8x128xf32>
    %720 = arith.addf %717, %719 : vector<8x128xf32>
    %721 = vector.broadcast %166 : f32 to vector<8x128xf32>
    %722 = arith.mulf %721, %263 : vector<8x128xf32>
    %723 = arith.addf %720, %722 : vector<8x128xf32>
    %724 = vector.broadcast %167 : f32 to vector<8x128xf32>
    %725 = arith.mulf %724, %272 : vector<8x128xf32>
    %726 = arith.addf %723, %725 : vector<8x128xf32>
    %727 = vector.broadcast %168 : f32 to vector<8x128xf32>
    %728 = arith.mulf %727, %281 : vector<8x128xf32>
    %729 = arith.addf %726, %728 : vector<8x128xf32>
    %730 = vector.broadcast %169 : f32 to vector<8x128xf32>
    %731 = arith.mulf %730, %290 : vector<8x128xf32>
    %732 = arith.addf %729, %731 : vector<8x128xf32>
    %733 = vector.broadcast %170 : f32 to vector<8x128xf32>
    %734 = arith.mulf %733, %299 : vector<8x128xf32>
    %735 = arith.addf %732, %734 : vector<8x128xf32>
    %736 = vector.broadcast %171 : f32 to vector<8x128xf32>
    %737 = arith.mulf %736, %308 : vector<8x128xf32>
    %738 = arith.addf %735, %737 : vector<8x128xf32>
    %739 = vector.broadcast %172 : f32 to vector<8x128xf32>
    %740 = arith.mulf %739, %317 : vector<8x128xf32>
    %741 = arith.addf %738, %740 : vector<8x128xf32>
    %742 = vector.broadcast %173 : f32 to vector<8x128xf32>
    %743 = arith.mulf %742, %326 : vector<8x128xf32>
    %744 = arith.addf %741, %743 : vector<8x128xf32>
    %745 = vector.broadcast %174 : f32 to vector<8x128xf32>
    %746 = arith.mulf %745, %335 : vector<8x128xf32>
    %747 = arith.addf %744, %746 : vector<8x128xf32>
    %748 = vector.broadcast %175 : f32 to vector<8x128xf32>
    %749 = arith.mulf %748, %344 : vector<8x128xf32>
    %750 = arith.addf %747, %749 : vector<8x128xf32>
    %cst_371 = arith.constant 0.000000e+00 : f32
    %751 = vector.broadcast %cst_371 : f32 to vector<8x128xf32>
    %752 = arith.maximumf %750, %751 : vector<8x128xf32>
    %753 = vector.broadcast %184 : f32 to vector<8x128xf32>
    %754 = arith.mulf %753, %395 : vector<8x128xf32>
    %755 = vector.broadcast %192 : f32 to vector<8x128xf32>
    %756 = arith.addf %754, %755 : vector<8x128xf32>
    %757 = vector.broadcast %185 : f32 to vector<8x128xf32>
    %758 = arith.mulf %757, %446 : vector<8x128xf32>
    %759 = arith.addf %756, %758 : vector<8x128xf32>
    %760 = vector.broadcast %186 : f32 to vector<8x128xf32>
    %761 = arith.mulf %760, %497 : vector<8x128xf32>
    %762 = arith.addf %759, %761 : vector<8x128xf32>
    %763 = vector.broadcast %187 : f32 to vector<8x128xf32>
    %764 = arith.mulf %763, %548 : vector<8x128xf32>
    %765 = arith.addf %762, %764 : vector<8x128xf32>
    %766 = vector.broadcast %188 : f32 to vector<8x128xf32>
    %767 = arith.mulf %766, %599 : vector<8x128xf32>
    %768 = arith.addf %765, %767 : vector<8x128xf32>
    %769 = vector.broadcast %189 : f32 to vector<8x128xf32>
    %770 = arith.mulf %769, %650 : vector<8x128xf32>
    %771 = arith.addf %768, %770 : vector<8x128xf32>
    %772 = vector.broadcast %190 : f32 to vector<8x128xf32>
    %773 = arith.mulf %772, %701 : vector<8x128xf32>
    %774 = arith.addf %771, %773 : vector<8x128xf32>
    %775 = vector.broadcast %191 : f32 to vector<8x128xf32>
    %776 = arith.mulf %775, %752 : vector<8x128xf32>
    %777 = arith.addf %774, %776 : vector<8x128xf32>
    %cst_372 = arith.constant 0.000000e+00 : f32
    %778 = vector.broadcast %cst_372 : f32 to vector<8x128xf32>
    %779 = arith.subf %778, %777 : vector<8x128xf32>
    %780 = math.exp %779 : vector<8x128xf32>
    %cst_373 = arith.constant 1.000000e+00 : f32
    %781 = vector.broadcast %cst_373 : f32 to vector<8x128xf32>
    %782 = arith.addf %781, %780 : vector<8x128xf32>
    %783 = tpu.reciprocal %782 : vector<8x128xf32> -> vector<8x128xf32>
    %784 = arith.index_cast %194 : i32 to index
    %c0_374 = arith.constant 0 : index
    %785 = vector.load %arg8[%784, %c0_374] : memref<8x128xf32, #tpu.memory_space<vmem>>, vector<8x128xf32>
    tpu.vector_store %arg8[%784, %c0_374], %783 {strides = array<i32>} : memref<8x128xf32, #tpu.memory_space<vmem>>, vector<8x128xf32>,
    %c1_i32 = arith.constant 1 : i32
    return
  }
  func.func @transform_0(%arg0: i32) -> (i32, i32, i32) {
    %c0_i32 = arith.constant 0 : i32
    %c0_i32_0 = arith.constant 0 : i32
    %c0_i32_1 = arith.constant 0 : i32
    return %c0_i32, %arg0, %c0_i32_0 : i32, i32, i32
  }
  func.func @transform_1(%arg0: i32) -> (i32, i32) {
    %c0_i32 = arith.constant 0 : i32
    %c0_i32_0 = arith.constant 0 : i32
    %c0_i32_1 = arith.constant 0 : i32
    return %c0_i32, %c0_i32_0 : i32, i32
  }
  func.func @transform_2(%arg0: i32) -> i32 {
    %c0_i32 = arith.constant 0 : i32
    %c0_i32_0 = arith.constant 0 : i32
    return %c0_i32 : i32
  }
  func.func @transform_3(%arg0: i32) -> (i32, i32) {
    %c0_i32 = arith.constant 0 : i32
    %c0_i32_0 = arith.constant 0 : i32
    %c0_i32_1 = arith.constant 0 : i32
    return %c0_i32, %c0_i32_0 : i32, i32
  }
  func.func @transform_4(%arg0: i32) -> i32 {
    %c0_i32 = arith.constant 0 : i32
    %c0_i32_0 = arith.constant 0 : i32
    return %c0_i32 : i32
  }
  func.func @transform_5(%arg0: i32) -> (i32, i32) {
    %c0_i32 = arith.constant 0 : i32
    %c0_i32_0 = arith.constant 0 : i32
    %c0_i32_1 = arith.constant 0 : i32
    return %c0_i32, %c0_i32_0 : i32, i32
  }
  func.func @transform_6(%arg0: i32) -> i32 {
    %c0_i32 = arith.constant 0 : i32
    %c0_i32_0 = arith.constant 0 : i32
    return %c0_i32 : i32
  }
  func.func @transform_7(%arg0: i32) -> (i32, i32) {
    %c0_i32 = arith.constant 0 : i32
    %c0_i32_0 = arith.constant 0 : i32
    return %arg0, %c0_i32 : i32, i32
  }
}

</mosaic_0001>

<bundles_post_ra>
// kernel: binary_moon_forward.1
= control target key start
LH: loop header
LB: loop body
LE: loop exit
PB: predicated region body
PF: predicated region fallthrough
CT: control target
= control target key end

     0   :  { %s2360_s0 = inlined_call_operand.vmem [shape: f32[2,8,128], index: 0, kind: input, shape index: {}]   ;;  %s2361_s1 = inlined_call_operand.vmem [shape: f32[16,2], index: 1, kind: input, shape index: {}]   ;;  %s2362_s2 = inlined_call_operand.vmem [shape: f32[16], index: 2, kind: input, shape index: {}]   ;;  %s2363_s3 = inlined_call_operand.vmem [shape: f32[8,16], index: 3, kind: input, shape index: {}]   ;;  %s2364_s4 = inlined_call_operand.vmem [shape: f32[8], index: 4, kind: input, shape index: {}]   ;;  %s2365_s5 = inlined_call_operand.vmem [shape: f32[1,8], index: 5, kind: input, shape index: {}]   ;;  %s2366_s6 = inlined_call_operand.<no memory space> [shape: f32[1], index: 6, kind: input, shape index: {}]   ;;  %s2367_s7 = inlined_call_operand.vmem [shape: f32[8,128], index: 7, kind: output, shape index: {}]  }
   0x1   :  { %2369 = sst [smem:[#allocation153_spill]] %s2366_s6 }
   0x2   :  { %2370 = sst [smem:[#allocation154_spill]] %s2367_s7 }
   0x3   :  { %13 = vsyncpa [#allocation4], 0 }
   0x4   :  { %14 = vsyncpa [#allocation6], 0  ;;  %s36_s26 = sshll.u32 %s2362_s2, 4  ;;  %s37_s26 = int_to_ptr.vmem [resolvable:$true] %s36_s26 }
   0x5   :  { %15 = vsyncpa [#allocation9], 0  ;;  %s56_s29 = sshll.u32 %s2364_s4, 4  ;;  %s1051_s30 = scalar_lea.vmem %s37_s26, 16  ;;  %s57_s29 = int_to_ptr.vmem [resolvable:$true] %s56_s29 }
   0x6   :  { %p1052_p0 = scmp.ne.s32.totalorder %s37_s26, %s1051_s30  ;;  %p1056_p1 = scmp.lt.s32.totalorder %s37_s26, %s37_s26 }
   0x7   :  { %p1057_p2 = scmp.lt.s32.totalorder %s1051_s30, %s1051_s30 }
   0x9   :  { %p1058_p3 = por %p1057_p2, %p1056_p1 }
   0xb   :  { %p1059_p4 = pnand %p1058_p3, %p1052_p0 }
   0xd   :  { %1062 = shalt.err (!%p1059_p4)
}
   0xe   :  { %s1117_s8 = smov [#allocation5]   ;;  %s1063_s9 = scalar_lea.vmem %s57_s29, 16 }
   0xf   :  { %39 = dma.vmem_to_smem %s37_s26, 16, %s1117_s8, [#allocation6]  }
  0x10   :  { %p1064_p5 = scmp.ne.s32.totalorder %s57_s29, %s1063_s9  ;;  %p1068_p6 = scmp.lt.s32.totalorder %s57_s29, %s57_s29 }
  0x11   :  { %p1069_p7 = scmp.lt.s32.totalorder %s1063_s9, %s1063_s9 }
  0x13   :  { %p1070_p8 = por %p1069_p7, %p1068_p6 }
  0x15   :  { %p1071_p9 = pnand %p1070_p8, %p1064_p5 }
  0x17   :  { %1074 = shalt.err (!%p1071_p9)
}
  0x18   :  { %s1118_s2 = smov [#allocation8]   ;;  %s23_s11 = sshll.u32 %s2361_s1, 4  ;;  %s24_s11 = int_to_ptr.vmem [resolvable:$true] %s23_s11 }
  0x19   :  { %59 = dma.vmem_to_smem %s57_s29, 16, %s1118_s2, [#allocation9]  }
  0x1a   :  { %s46_s14 = sshll.u32 %s2363_s3, 4  ;;  %s1075_s15 = scalar_lea.vmem %s24_s11, 256  ;;  %s47_s14 = int_to_ptr.vmem [resolvable:$true] %s46_s14 }
  0x1b   :  { %p1076_p10 = scmp.ne.s32.totalorder %s24_s11, %s1075_s15  ;;  %p1080_p11 = scmp.lt.s32.totalorder %s24_s11, %s24_s11 }
  0x1c   :  { %p1081_p12 = scmp.lt.s32.totalorder %s1075_s15, %s1075_s15 }
  0x1e   :  { %p1082_p13 = por %p1081_p12, %p1080_p11 }
  0x20   :  { %p1083_p0 = pnand %p1082_p13, %p1076_p10 }
  0x22   :  { %1086 = shalt.err (!%p1083_p0)
}
  0x23   :  { %s1119_s16 = smov [#allocation3]   ;;  %s1120_s17 = smov 128  }
  0x24   :  { %s1121_s18 = smov 8   ;;  %s1087_s19 = scalar_lea.vmem %s47_s14, 128 }
  0x25   :  { %29 = dma.vmem_to_smem %s24_s11, 256, %s1119_s16, [#allocation4], %s1120_s17, %s1120_s17, %s1121_s18  }
  0x26   :  { %p1088_p1 = scmp.ne.s32.totalorder %s47_s14, %s1087_s19  ;;  %p1092_p2 = scmp.lt.s32.totalorder %s47_s14, %s47_s14 }
  0x27   :  { %p1093_p3 = scmp.lt.s32.totalorder %s1087_s19, %s1087_s19 }
  0x29   :  { %p1094_p4 = por %p1093_p3, %p1092_p2 }
  0x2b   :  { %p1095_p5 = pnand %p1094_p4, %p1088_p1 }
  0x2d   :  { %1098 = shalt.err (!%p1095_p5)
}
  0x2e   :  { %s1122_s1 = smov [#allocation7]   ;;  %s66_s21 = sshll.u32 %s2365_s5, 4  ;;  %s67_s21 = int_to_ptr.vmem [resolvable:$true] %s66_s21 }
  0x2f   :  { %49 = dma.vmem_to_smem %s47_s14, 128, %s1122_s1, [#allocation6]  }
  0x30   :  { %s1099_s22 = scalar_lea.vmem %s67_s21, 16  ;;  %p1104_p7 = scmp.lt.s32.totalorder %s67_s21, %s67_s21 }
  0x31   :  { %p1100_p6 = scmp.ne.s32.totalorder %s67_s21, %s1099_s22  ;;  %p1105_p8 = scmp.lt.s32.totalorder %s1099_s22, %s1099_s22 }
  0x33   :  { %p1106_p9 = por %p1105_p8, %p1104_p7 }
  0x35   :  { %p1107_p10 = pnand %p1106_p9, %p1100_p6 }
  0x37   :  { %1110 = shalt.err (!%p1107_p10)
}
  0x38   :  { %s1123_s23 = smov [#allocation10]  }
  0x39   :  { %69 = dma.vmem_to_smem %s67_s21, 16, %s1123_s23, [#allocation9]  }
  0x3a   :  { %1111 = dma.done.wait [#allocation4], 256  }
  0x3b   :  { %1112 = vsyncadd [#allocation4], 4294967040 }
  0x3c   :  { %1113 = dma.done.wait [#allocation6], 144  }
  0x3d   :  { %1114 = vsyncadd [#allocation6], 4294967152 }
  0x3e   :  { %1115 = dma.done.wait [#allocation9], 32  }
  0x3f   :  { %1116 = vsyncadd [#allocation9], 4294967264 }
  0x40   :  { %87 = sfence }
  0x41   :  { %s1179_s24 = sld [smem:[#allocation3]]  ;;  %v1348_v0 = vld [vmem:[%s2360_s0] sm:$0xff]  ;;  %v1353_v1 = vld [vmem:[%s2360_s0 + $0x8] sm:$0xff] }
  0x42   :  { %s1181_s5 = sld [smem:[#allocation3 + $0x1]] }
  0x43   :  { %s1183_s25 = sld [smem:[#allocation3 + $0x80]] }
  0x44   :  { %s1185_s26 = sld [smem:[#allocation3 + $0x81]] }
  0x45   :  { %s1187_s27 = sld [smem:[#allocation3 + $0x100]] }
  0x46   :  { %s1189_s28 = sld [smem:[#allocation3 + $0x101]] }
  0x47   :  { %s1191_s29 = sld [smem:[#allocation3 + $0x180]]  ;;  %v285_v2 = vstv %s1179_s24 }
  0x48   :  { %s1193_s30 = sld [smem:[#allocation3 + $0x181]]  ;;  %v287_v3 = vstv %s1181_s5  ;;  %v286_v6 = vmul.f32 %v285_v2, %v1348_v0 }
  0x49   :  { %s1195_s8 = sld [smem:[#allocation3 + $0x200]]  ;;  %v293_v4 = vstv %s1183_s25  ;;  %v288_v7 = vmul.f32 %v1353_v1, %v287_v3 }
  0x4a   :  { %s1197_s9 = sld [smem:[#allocation3 + $0x201]]  ;;  %v295_v5 = vstv %s1185_s26  ;;  %v294_v8 = vmul.f32 %v293_v4, %v1348_v0 }
  0x4b   :  { %s1199_s2 = sld [smem:[#allocation3 + $0x280]]  ;;  %v296_v9 = vmul.f32 %v1353_v1, %v295_v5  ;;  %v301_v10 = vstv %s1187_s27  ;;  %v289_v18 = vadd.f32 %v288_v7, %v286_v6 }
  0x4c   :  { %s1201_s4 = sld [smem:[#allocation3 + $0x281]]  ;;  %v303_v11 = vstv %s1189_s28  ;;  %v302_v21 = vmul.f32 %v301_v10, %v1348_v0 }
  0x4d   :  { %s1203_s10 = sld [smem:[#allocation3 + $0x300]]  ;;  %v309_v12 = vstv %s1191_s29  ;;  %v297_v20 = vadd.f32 %v296_v9, %v294_v8  ;;  %v304_v23 = vmul.f32 %v1353_v1, %v303_v11 }
  0x4e   :  { %s1205_s11 = sld [smem:[#allocation3 + $0x301]]  ;;  %v311_v13 = vstv %s1193_s30  ;;  %v310_v24 = vmul.f32 %v309_v12, %v1348_v0 }
  0x4f   :  { %s1207_s12 = sld [smem:[#allocation3 + $0x380]]  ;;  %v317_v14 = vstv %s1195_s8  ;;  %v312_v25 = vmul.f32 %v1353_v1, %v311_v13  ;;  %v305_v34 = vadd.f32 %v304_v23, %v302_v21 }
  0x50   :  { %s1209_s13 = sld [smem:[#allocation3 + $0x381]]  ;;  %v319_v15 = vstv %s1197_s9  ;;  %v318_v26 = vmul.f32 %v317_v14, %v1348_v0 }
  0x51   :  { %s1211_s14 = sld [smem:[#allocation3 + $0x400]]  ;;  %v325_v16 = vstv %s1199_s2  ;;  %v320_v27 = vmul.f32 %v1353_v1, %v319_v15  ;;  %v313_v35 = vadd.f32 %v312_v25, %v310_v24 }
  0x52   :  { %s1213_s15 = sld [smem:[#allocation3 + $0x401]]  ;;  %v327_v17 = vstv %s1201_s4  ;;  %v326_v28 = vmul.f32 %v325_v16, %v1348_v0 }
  0x53   :  { %s1215_s16 = sld [smem:[#allocation3 + $0x480]]  ;;  %v328_v29 = vmul.f32 %v1353_v1, %v327_v17  ;;  %v333_v30 = vstv %s1203_s10  ;;  %v321_v38 = vadd.f32 %v320_v27, %v318_v26 }
  0x54   :  { %s1217_s17 = sld [smem:[#allocation3 + $0x481]]  ;;  %v335_v31 = vstv %s1205_s11  ;;  %v334_v40 = vmul.f32 %v333_v30, %v1348_v0 }
  0x55   :  { %s1219_s18 = sld [smem:[#allocation3 + $0x500]]  ;;  %v329_v39 = vadd.f32 %v328_v29, %v326_v28  ;;  %v336_v41 = vmul.f32 %v1353_v1, %v335_v31  ;;  %v341_v42 = vstv %s1207_s12 }
  0x56   :  { %2371 = sst [smem:[#allocation14_spill]] %s1209_s13  ;;  %v342_v50 = vmul.f32 %v341_v42, %v1348_v0 }
  0x57   :  { %2372 = sst [smem:[#allocation15_spill]] %s1211_s14  ;;  %v337_v56 = vadd.f32 %v336_v41, %v334_v40 }
  0x58   :  { %2373 = sst [smem:[#allocation16_spill]] %s1213_s15 }
  0x59   :  { %2374 = sst [smem:[#allocation17_spill]] %s1215_s16 }
  0x5a   :  { %2375 = sst [smem:[#allocation18_spill]] %s1217_s17 }
  0x5b   :  { %2376 = sst [smem:[#allocation19_spill]] %s1219_s18 }
  0x5c   :  { %s1221_s19 = sld [smem:[#allocation3 + $0x501]] }
  0x5d   :  { %s1223_s1 = sld [smem:[#allocation3 + $0x580]] }
  0x5e   :  { %s1225_s3 = sld [smem:[#allocation3 + $0x581]] }
  0x5f   :  { %s1227_s20 = sld [smem:[#allocation3 + $0x600]] }
  0x60   :  { %s1229_s21 = sld [smem:[#allocation3 + $0x601]] }
  0x61   :  { %s1231_s22 = sld [smem:[#allocation3 + $0x680]] }
  0x62   :  { %2377 = sst [smem:[#allocation20_spill]] %s1221_s19 }
  0x63   :  { %2378 = sst [smem:[#allocation21_spill]] %s1223_s1 }
  0x64   :  { %2379 = sst [smem:[#allocation22_spill]] %s1225_s3 }
  0x65   :  { %2380 = sst [smem:[#allocation23_spill]] %s1227_s20 }
  0x66   :  { %2381 = sst [smem:[#allocation24_spill]] %s1229_s21 }
  0x67   :  { %2382 = sst [smem:[#allocation25_spill]] %s1231_s22 }
  0x68   :  { %s1233_s23 = sld [smem:[#allocation3 + $0x681]] }
  0x69   :  { %s1235_s7 = sld [smem:[#allocation3 + $0x700]] }
  0x6a   :  { %s1237_s6 = sld [smem:[#allocation3 + $0x701]] }
  0x6b   :  { %s1239_s17 = sld [smem:[#allocation3 + $0x780]] }
  0x6c   :  { %s1241_s18 = sld [smem:[#allocation3 + $0x781]] }
  0x6d   :  { %s1243_s19 = sld [smem:[#allocation5]] }
  0x6e   :  { %2383 = sst [smem:[#allocation26_spill]] %s1233_s23 }
  0x6f   :  { %2384 = sst [smem:[#allocation27_spill]] %s1235_s7 }
  0x70   :  { %2385 = sst [smem:[#allocation28_spill]] %s1237_s6 }
  0x71   :  { %2386 = sst [smem:[#allocation29_spill]] %s1239_s17 }
  0x72   :  { %2387 = sst [smem:[#allocation30_spill]] %s1241_s18 }
  0x73   :  { %s1245_s1 = sld [smem:[#allocation5 + $0x1]]  ;;  %v290_v19 = vstv %s1243_s19 }
  0x74   :  { %s1247_s3 = sld [smem:[#allocation5 + $0x2]]  ;;  %v291_v32 = vadd.f32 %v290_v19, %v289_v18 }
  0x75   :  { %s1249_s20 = sld [smem:[#allocation5 + $0x3]] }
  0x76   :  { %s1251_s21 = sld [smem:[#allocation5 + $0x4]]  ;;  %v1425_v46 = vmax.f32 %v291_v32, 0.0 }
  0x77   :  { %s1253_s22 = sld [smem:[#allocation5 + $0x5]] }
  0x78   :  { %s1255_s23 = sld [smem:[#allocation5 + $0x6]] }
  0x79   :  { %s1257_s7 = sld [smem:[#allocation5 + $0x7]]  ;;  %v298_v22 = vstv %s1245_s1 }
  0x7a   :  { %s1259_s6 = sld [smem:[#allocation5 + $0x8]]  ;;  %v299_v33 = vadd.f32 %v298_v22, %v297_v20  ;;  %v306_v36 = vstv %s1247_s3 }
  0x7b   :  { %s1261_s17 = sld [smem:[#allocation5 + $0x9]]  ;;  %v314_v37 = vstv %s1249_s20  ;;  %v1429_v48 = vadd.f32 %v306_v36, %v305_v34 }
  0x7c   :  { %2388 = sst [smem:[#allocation31_spill]] %s1251_s21  ;;  %v1427_v47 = vmax.f32 %v299_v33, 0.0  ;;  %v1431_v49 = vadd.f32 %v314_v37, %v313_v35 }
  0x7d   :  { %2389 = sst [smem:[#allocation32_spill]] %s1253_s22  ;;  %v1507_v40 = vmax.f32 %v1429_v48, 0.0 }
  0x7e   :  { %2390 = sst [smem:[#allocation33_spill]] %s1255_s23  ;;  %v1510_v41 = vmax.f32 %v1431_v49, 0.0 }
  0x7f   :  { %2391 = sst [smem:[#allocation34_spill]] %s1257_s7 }
  0x80   :  { %2392 = sst [smem:[#allocation35_spill]] %s1259_s6 }
  0x81   :  { %2393 = sst [smem:[#allocation36_spill]] %s1261_s17 }
  0x82   :  { %s1263_s18 = sld [smem:[#allocation5 + $0xa]] }
  0x83   :  { %s1265_s16 = sld [smem:[#allocation5 + $0xb]] }
  0x84   :  { %s1267_s15 = sld [smem:[#allocation5 + $0xc]] }
  0x85   :  { %s1269_s14 = sld [smem:[#allocation5 + $0xd]] }
  0x86   :  { %s1271_s13 = sld [smem:[#allocation5 + $0xe]] }
  0x87   :  { %s1273_s21 = sld [smem:[#allocation5 + $0xf]] }
  0x88   :  { %2394 = sst [smem:[#allocation37_spill]] %s1263_s18 }
  0x89   :  { %2395 = sst [smem:[#allocation38_spill]] %s1265_s16 }
  0x8a   :  { %2396 = sst [smem:[#allocation39_spill]] %s1267_s15 }
  0x8b   :  { %2397 = sst [smem:[#allocation40_spill]] %s1269_s14 }
  0x8c   :  { %2398 = sst [smem:[#allocation41_spill]] %s1271_s13 }
  0x8d   :  { %2399 = sst [smem:[#allocation42_spill]] %s1273_s21 }
  0x8e   :  { %s1275_s22 = sld [smem:[#allocation7]] }
  0x8f   :  { %s1277_s23 = sld [smem:[#allocation7 + $0x1]] }
  0x90   :  { %s1279_s7 = sld [smem:[#allocation7 + $0x2]] }
  0x91   :  { %s1281_s6 = sld [smem:[#allocation7 + $0x3]] }
  0x92   :  { %s1283_s17 = sld [smem:[#allocation7 + $0x4]] }
  0x93   :  { %s1285_s18 = sld [smem:[#allocation7 + $0x5]] }
  0x94   :  { %2400 = sst [smem:[#allocation43_spill]] %s1275_s22 }
  0x95   :  { %2401 = sst [smem:[#allocation44_spill]] %s1277_s23 }
  0x96   :  { %2402 = sst [smem:[#allocation45_spill]] %s1279_s7 }
  0x97   :  { %2403 = sst [smem:[#allocation46_spill]] %s1281_s6 }
  0x98   :  { %2404 = sst [smem:[#allocation47_spill]] %s1283_s17 }
  0x99   :  { %2405 = sst [smem:[#allocation48_spill]] %s1285_s18 }
  0x9a   :  { %s1287_s16 = sld [smem:[#allocation7 + $0x6]] }
  0x9b   :  { %s1289_s15 = sld [smem:[#allocation7 + $0x7]] }
  0x9c   :  { %s1291_s14 = sld [smem:[#allocation7 + $0x8]] }
  0x9d   :  { %s1293_s13 = sld [smem:[#allocation7 + $0x9]] }
  0x9e   :  { %s1295_s21 = sld [smem:[#allocation7 + $0xa]] }
  0x9f   :  { %s1297_s22 = sld [smem:[#allocation7 + $0xb]] }
  0xa0   :  { %2406 = sst [smem:[#allocation49_spill]] %s1287_s16 }
  0xa1   :  { %2407 = sst [smem:[#allocation50_spill]] %s1289_s15 }
  0xa2   :  { %2408 = sst [smem:[#allocation51_spill]] %s1291_s14 }
  0xa3   :  { %2409 = sst [smem:[#allocation52_spill]] %s1293_s13 }
  0xa4   :  { %2410 = sst [smem:[#allocation53_spill]] %s1295_s21 }
  0xa5   :  { %2411 = sst [smem:[#allocation54_spill]] %s1297_s22 }
  0xa6   :  { %s1299_s23 = sld [smem:[#allocation7 + $0xc]] }
  0xa7   :  { %s1301_s7 = sld [smem:[#allocation7 + $0xd]] }
  0xa8   :  { %s1303_s6 = sld [smem:[#allocation7 + $0xe]] }
  0xa9   :  { %s1305_s17 = sld [smem:[#allocation7 + $0xf]] }
  0xaa   :  { %s1307_s18 = sld [smem:[#allocation7 + $0x80]] }
  0xab   :  { %s1309_s16 = sld [smem:[#allocation7 + $0x81]] }
  0xac   :  { %2412 = sst [smem:[#allocation55_spill]] %s1299_s23 }
  0xad   :  { %2413 = sst [smem:[#allocation56_spill]] %s1301_s7 }
  0xae   :  { %2414 = sst [smem:[#allocation57_spill]] %s1303_s6 }
  0xaf   :  { %2415 = sst [smem:[#allocation58_spill]] %s1305_s17 }
  0xb0   :  { %2416 = sst [smem:[#allocation59_spill]] %s1307_s18 }
  0xb1   :  { %2417 = sst [smem:[#allocation60_spill]] %s1309_s16 }
  0xb2   :  { %s1311_s15 = sld [smem:[#allocation7 + $0x82]] }
  0xb3   :  { %s1313_s14 = sld [smem:[#allocation7 + $0x83]] }
  0xb4   :  { %s1315_s13 = sld [smem:[#allocation7 + $0x84]] }
  0xb5   :  { %s1317_s21 = sld [smem:[#allocation7 + $0x85]] }
  0xb6   :  { %s1319_s22 = sld [smem:[#allocation7 + $0x86]] }
  0xb7   :  { %s1321_s7 = sld [smem:[#allocation7 + $0x87]] }
  0xb8   :  { %2418 = sst [smem:[#allocation61_spill]] %s1311_s15 }
  0xb9   :  { %2419 = sst [smem:[#allocation62_spill]] %s1313_s14 }
  0xba   :  { %2420 = sst [smem:[#allocation63_spill]] %s1315_s13 }
  0xbb   :  { %2421 = sst [smem:[#allocation64_spill]] %s1317_s21 }
  0xbc   :  { %2422 = sst [smem:[#allocation65_spill]] %s1319_s22 }
  0xbd   :  { %2423 = sst [smem:[#allocation66_spill]] %s1321_s7 }
  0xbe   :  { %s1323_s6 = sld [smem:[#allocation7 + $0x88]] }
  0xbf   :  { %s1325_s18 = sld [smem:[#allocation7 + $0x89]] }
  0xc0   :  { %s1327_s16 = sld [smem:[#allocation7 + $0x8a]] }
  0xc1   :  { %s1329_s15 = sld [smem:[#allocation7 + $0x8b]] }
  0xc2   :  { %s1331_s14 = sld [smem:[#allocation7 + $0x8c]] }
  0xc3   :  { %s1333_s13 = sld [smem:[#allocation7 + $0x8d]] }
  0xc4   :  { %2424 = sst [smem:[#allocation67_spill]] %s1323_s6 }
  0xc5   :  { %2425 = sst [smem:[#allocation68_spill]] %s1325_s18 }
  0xc6   :  { %s1335_s21 = sld [smem:[#allocation7 + $0x8e]] }
  0xc7   :  { %2426 = sst [smem:[#allocation69_spill]] %s1329_s15 }
  0xc8   :  { %2427 = sst [smem:[#allocation70_spill]] %s1331_s14 }
  0xc9   :  { %s1337_s22 = sld [smem:[#allocation7 + $0x8f]] }
  0xca   :  { %s1339_s7 = sld [smem:[#allocation7 + $0x100]] }
  0xcb   :  { %s1341_s17 = sld [smem:[#allocation7 + $0x101]] }
  0xcc   :  { %2428 = sst [smem:[#allocation71_spill]] %s1335_s21 }
  0xcd   :  { %s1343_s6 = sld [smem:[#allocation7 + $0x102]] }
  0xce   :  { %s1355_s21 = sld [smem:[#allocation7 + $0x103]] }
  0xcf   :  { %s1361_s18 = sld [smem:[#allocation7 + $0x104]] }
  0xd0   :  { %s1363_s23 = sld [smem:[#allocation7 + $0x105]] }
  0xd1   :  { %s1365_s14 = sld [smem:[#allocation7 + $0x106]] }
  0xd2   :  { %s1371_s0 = sld [smem:[#allocation7 + $0x107]] }
  0xd3   :  { %s1374_s24 = sld [smem:[#allocation7 + $0x108]] }
  0xd4   :  { %s1379_s5 = sld [smem:[#allocation7 + $0x109]] }
  0xd5   :  { %s1385_s25 = sld [smem:[#allocation7 + $0x10a]] }
  0xd6   :  { %s1389_s26 = sld [smem:[#allocation7 + $0x10b]] }
  0xd7   :  { %s1395_s27 = sld [smem:[#allocation7 + $0x10c]] }
  0xd8   :  { %s1401_s28 = sld [smem:[#allocation7 + $0x10d]] }
  0xd9   :  { %s1403_s29 = sld [smem:[#allocation7 + $0x10e]] }
  0xda   :  { %s2431_s30 = sld [smem:[#allocation14_spill]] }
  0xdb   :  { %s1407_s8 = sld [smem:[#allocation7 + $0x10f]] }
  0xdc   :  { %s2433_s9 = sld [smem:[#allocation31_spill]] }
  0xdd   :  { %s2434_s2 = sld [smem:[#allocation32_spill]] }
  0xde   :  { %2429 = sst [smem:[#allocation72_spill]] %s1401_s28 }
  0xdf   :  { %2430 = sst [smem:[#allocation73_spill]] %s1403_s29 }
  0xe0   :  { %s1409_s4 = sld [smem:[#allocation7 + $0x180]]  ;;  %v343_v43 = vstv %s2431_s30 }
  0xe1   :  { %2432 = sst [smem:[#allocation14_spill]] %s1407_s8  ;;  %v344_v51 = vmul.f32 %v1353_v1, %v343_v43 }
  0xe2   :  { %s1413_s15 = sld [smem:[#allocation7 + $0x181]]  ;;  %v322_v44 = vstv %s2433_s9 }
  0xe3   :  { %s2437_s10 = sld [smem:[#allocation15_spill]]  ;;  %v330_v45 = vstv %s2434_s2  ;;  %v1441_v54 = vadd.f32 %v322_v44, %v321_v38  ;;  %v345_v4 = vadd.f32 %v344_v51, %v342_v50 }
  0xe4   :  { %s2438_s11 = sld [smem:[#allocation16_spill]]  ;;  %v1443_v55 = vadd.f32 %v330_v45, %v329_v39 }
  0xe5   :  { %s1419_s19 = sld [smem:[#allocation7 + $0x182]]  ;;  %v1515_v44 = vmax.f32 %v1441_v54, 0.0 }
  0xe6   :  { %2435 = sst [smem:[#allocation31_spill]] %s1409_s4 }
  0xe7   :  { %s2440_s1 = sld [smem:[#allocation33_spill]] }
  0xe8   :  { %2436 = sst [smem:[#allocation32_spill]] %s1413_s15 }
  0xe9   :  { %s1423_s4 = sld [smem:[#allocation7 + $0x183]]  ;;  %v349_v52 = vstv %s2437_s10 }
  0xea   :  { %s2442_s3 = sld [smem:[#allocation17_spill]]  ;;  %v351_v53 = vstv %s2438_s11  ;;  %v350_v62 = vmul.f32 %v349_v52, %v1348_v0  ;;  %v1524_v52 = vmax.f32 %v1443_v55, 0.0 }
  0xeb   :  { %2439 = sst [smem:[#allocation15_spill]] %s1419_s19  ;;  %v352_v63 = vmul.f32 %v1353_v1, %v351_v53 }
  0xec   :  { %s2443_s20 = sld [smem:[#allocation18_spill]] }
  0xed   :  { %s2444_s15 = sld [smem:[#allocation19_spill]]  ;;  %v338_v57 = vstv %s2440_s1  ;;  %v353_v22 = vadd.f32 %v352_v63, %v350_v62 }
  0xee   :  { %s2445_s8 = sld [smem:[#allocation20_spill]]  ;;  %v339_v20 = vadd.f32 %v338_v57, %v337_v56 }
  0xef   :  { %2441 = sst [smem:[#allocation16_spill]] %s1423_s4 }
  0xf0   :  { %s1433_s12 = sld [smem:[#allocation7 + $0x184]]  ;;  %v357_v58 = vstv %s2442_s3  ;;  %v1526_v53 = vmax.f32 %v339_v20, 0.0 }
  0xf1   :  { %s2447_s30 = sld [smem:[#allocation21_spill]]  ;;  %v358_v8 = vmul.f32 %v357_v58, %v1348_v0 }
  0xf2   :  { %s2448_s9 = sld [smem:[#allocation22_spill]]  ;;  %v359_v59 = vstv %s2443_s20 }
  0xf3   :  { %s1439_s2 = sld [smem:[#allocation7 + $0x185]]  ;;  %v365_v60 = vstv %s2444_s15  ;;  %v360_v9 = vmul.f32 %v1353_v1, %v359_v59 }
  0xf4   :  { %s2450_s4 = sld [smem:[#allocation34_spill]]  ;;  %v367_v61 = vstv %s2445_s8  ;;  %v366_v10 = vmul.f32 %v365_v60, %v1348_v0 }
  0xf5   :  { %s2451_s19 = sld [smem:[#allocation23_spill]]  ;;  %v368_v11 = vmul.f32 %v1353_v1, %v367_v61  ;;  %v361_v28 = vadd.f32 %v360_v9, %v358_v8 }
  0xf6   :  { %2446 = sst [smem:[#allocation33_spill]] %s1433_s12 }
  0xf7   :  { %s2452_s29 = sld [smem:[#allocation24_spill]]  ;;  %v373_v2 = vstv %s2447_s30  ;;  %v369_v32 = vadd.f32 %v368_v11, %v366_v10 }
  0xf8   :  { %s1446_s12 = sld [smem:[#allocation7 + $0x186]]  ;;  %v375_v3 = vstv %s2448_s9  ;;  %v374_v12 = vmul.f32 %v373_v2, %v1348_v0 }
  0xf9   :  { %2449 = sst [smem:[#allocation17_spill]] %s1439_s2  ;;  %v376_v13 = vmul.f32 %v1353_v1, %v375_v3 }
  0xfa   :  { %s1452_s10 = sld [smem:[#allocation7 + $0x187]]  ;;  %v346_v5 = vstv %s2450_s4 }
  0xfb   :  { %s2453_s11 = sld [smem:[#allocation25_spill]]  ;;  %v381_v6 = vstv %s2451_s19  ;;  %v347_v21 = vadd.f32 %v346_v5, %v345_v4  ;;  %v377_v34 = vadd.f32 %v376_v13, %v374_v12 }
  0xfc   :  { %s2454_s2 = sld [smem:[#allocation26_spill]]  ;;  %v382_v16 = vmul.f32 %v381_v6, %v1348_v0 }
  0xfd   :  { %s1458_s28 = sld [smem:[#allocation7 + $0x188]]  ;;  %v383_v7 = vstv %s2452_s29  ;;  %v1528_v54 = vmax.f32 %v347_v21, 0.0 }
  0xfe   :  { %s2455_s1 = sld [smem:[#allocation27_spill]]  ;;  %v384_v17 = vmul.f32 %v1353_v1, %v383_v7 }
  0xff   :  { %s2456_s3 = sld [smem:[#allocation28_spill]] }
 0x100   :  { %s1463_s15 = sld [smem:[#allocation7 + $0x189]]  ;;  %v385_v35 = vadd.f32 %v384_v17, %v382_v16 }
 0x101   :  { %s2458_s8 = sld [smem:[#allocation35_spill]]  ;;  %v389_v14 = vstv %s2453_s11 }
 0x102   :  { %s1469_s20 = sld [smem:[#allocation7 + $0x18a]]  ;;  %v391_v15 = vstv %s2454_s2  ;;  %v390_v24 = vmul.f32 %v389_v14, %v1348_v0 }
 0x103   :  { %s2460_s4 = sld [smem:[#allocation29_spill]]  ;;  %v392_v25 = vmul.f32 %v1353_v1, %v391_v15 }
 0x104   :  { %s2461_s29 = sld [smem:[#allocation30_spill]]  ;;  %v397_v18 = vstv %s2455_s1 }
 0x105   :  { %s1475_s19 = sld [smem:[#allocation7 + $0x18b]]  ;;  %v399_v19 = vstv %s2456_s3  ;;  %v398_v30 = vmul.f32 %v397_v18, %v1348_v0  ;;  %v393_v43 = vadd.f32 %v392_v25, %v390_v24 }
 0x106   :  { %2457 = sst [smem:[#allocation18_spill]] %s1463_s15  ;;  %v400_v31 = vmul.f32 %v1353_v1, %v399_v19 }
 0x107   :  { %s2463_s30 = sld [smem:[#allocation36_spill]]  ;;  %v354_v23 = vstv %s2458_s8 }
 0x108   :  { %2459 = sst [smem:[#allocation19_spill]] %s1469_s20  ;;  %v355_v42 = vadd.f32 %v354_v23, %v353_v22 }
 0x109   :  { %s1481_s9 = sld [smem:[#allocation7 + $0x18c]]  ;;  %v405_v26 = vstv %s2460_s4 }
 0x10a   :  { %s2465_s20 = sld [smem:[#allocation37_spill]]  ;;  %v407_v27 = vstv %s2461_s29  ;;  %v406_v38 = vmul.f32 %v405_v26, %v1348_v0  ;;  %v1532_v57 = vmax.f32 %v355_v42, 0.0 }
 0x10b   :  { %2462 = sst [smem:[#allocation20_spill]] %s1475_s19  ;;  %v408_v39 = vmul.f32 %v1353_v1, %v407_v27  ;;  %v401_v1 = vadd.f32 %v400_v31, %v398_v30 }
 0x10c   :  { %s1484_s15 = sld [smem:[#allocation7 + $0x18d]] }
 0x10d   :  { %s2467_s2 = sld [smem:[#allocation38_spill]]  ;;  %v362_v29 = vstv %s2463_s30  ;;  %v409_v56 = vadd.f32 %v408_v39, %v406_v38 }
 0x10e   :  { %s2468_s11 = sld [smem:[#allocation39_spill]]  ;;  %v363_v45 = vadd.f32 %v362_v29, %v361_v28 }
 0x10f   :  { %2464 = sst [smem:[#allocation21_spill]] %s1481_s9 }
 0x110   :  { %s1490_s19 = sld [smem:[#allocation7 + $0x18e]]  ;;  %v370_v33 = vstv %s2465_s20  ;;  %v1538_v61 = vmax.f32 %v363_v45, 0.0 }
 0x111   :  { %s1495_s1 = sld [smem:[#allocation7 + $0x18f]]  ;;  %v371_v50 = vadd.f32 %v370_v33, %v369_v32 }
 0x112   :  { %2466 = sst [smem:[#allocation22_spill]] %s1484_s15 }
 0x113   :  { %s2471_s3 = sld [smem:[#allocation40_spill]]  ;;  %v378_v36 = vstv %s2467_s2  ;;  %v1544_v2 = vmax.f32 %v371_v50, 0.0 }
 0x114   :  { %s1498_s8 = sld [smem:[#allocation7 + $0x200]]  ;;  %v386_v37 = vstv %s2468_s11  ;;  %v379_v48 = vadd.f32 %v378_v36, %v377_v34 }
 0x115   :  { %s2473_s4 = sld [smem:[#allocation41_spill]]  ;;  %v387_v51 = vadd.f32 %v386_v37, %v385_v35 }
 0x116   :  { %2469 = sst [smem:[#allocation34_spill]] %s1490_s19  ;;  %v1546_v3 = vmax.f32 %v379_v48, 0.0 }
 0x117   :  { %2470 = sst [smem:[#allocation23_spill]] %s1495_s1  ;;  %v1548_v4 = vmax.f32 %v387_v51, 0.0 }
 0x118   :  { %s1504_s29 = sld [smem:[#allocation7 + $0x201]] }
 0x119   :  { %s1512_s20 = sld [smem:[#allocation7 + $0x202]]  ;;  %v394_v0 = vstv %s2471_s3 }
 0x11a   :  { %2472 = sst [smem:[#allocation24_spill]] %s1498_s8  ;;  %v395_v58 = vadd.f32 %v394_v0, %v393_v43 }
 0x11b   :  { %s2476_s30 = sld [smem:[#allocation42_spill]]  ;;  %v402_v49 = vstv %s2473_s4 }
 0x11c   :  { %s2477_s2 = sld [smem:[#allocation43_spill]]  ;;  %v403_v55 = vadd.f32 %v402_v49, %v401_v1  ;;  %v1560_v10 = vmax.f32 %v395_v58, 0.0 }
 0x11d   :  { %s1518_s11 = sld [smem:[#allocation7 + $0x203]] }
 0x11e   :  { %2474 = sst [smem:[#allocation25_spill]] %s1504_s29  ;;  %v1571_v14 = vmax.f32 %v403_v55, 0.0  ;;  %v494_v55 = vstv %s1327_s16 }
 0x11f   :  { %2475 = sst [smem:[#allocation26_spill]] %s1512_s20 }
 0x120   :  { %s2479_s29 = sld [smem:[#allocation44_spill]] }
 0x121   :  { %s2480_s8 = sld [smem:[#allocation45_spill]]  ;;  %v410_v59 = vstv %s2476_s30 }
 0x122   :  { %s1521_s1 = sld [smem:[#allocation7 + $0x204]]  ;;  %v413_v60 = vstv %s2477_s2  ;;  %v411_v6 = vadd.f32 %v410_v59, %v409_v56 }
 0x123   :  { %2478 = sst [smem:[#allocation27_spill]] %s1518_s11  ;;  %v1554_v7 = vmul.f32 %v413_v60, %v1425_v46 }
 0x124   :  { %s2482_s3 = sld [smem:[#allocation46_spill]]  ;;  %v1590_v22 = vmax.f32 %v411_v6, 0.0 }
 0x125   :  { %s1530_s20 = sld [smem:[#allocation7 + $0x205]] }
 0x126   :  { %s2484_s11 = sld [smem:[#allocation47_spill]]  ;;  %v417_v62 = vstv %s2479_s29 }
 0x127   :  { %s2485_s19 = sld [smem:[#allocation48_spill]]  ;;  %v420_v63 = vstv %s2480_s8  ;;  %v1563_v11 = vmul.f32 %v417_v62, %v1427_v47 }
 0x128   :  { %2481 = sst [smem:[#allocation28_spill]] %s1521_s1  ;;  %v1566_v12 = vmul.f32 %v420_v63, %v1507_v40 }
 0x129   :  { %s1536_s4 = sld [smem:[#allocation7 + $0x206]] }
 0x12a   :  { %s2487_s1 = sld [smem:[#allocation49_spill]]  ;;  %v423_v5 = vstv %s2482_s3 }
 0x12b   :  { %2483 = sst [smem:[#allocation35_spill]] %s1530_s20  ;;  %v1574_v15 = vmul.f32 %v423_v5, %v1510_v41 }
 0x12c   :  { %s1542_s15 = sld [smem:[#allocation7 + $0x207]]  ;;  %v426_v8 = vstv %s2484_s11 }
 0x12d   :  { %s2489_s20 = sld [smem:[#allocation50_spill]]  ;;  %v429_v9 = vstv %s2485_s19  ;;  %v1581_v18 = vmul.f32 %v426_v8, %v1515_v44 }
 0x12e   :  { %s2490_s30 = sld [smem:[#allocation51_spill]]  ;;  %v1584_v19 = vmul.f32 %v429_v9, %v1524_v52 }
 0x12f   :  { %2486 = sst [smem:[#allocation29_spill]] %s1536_s4 }
 0x130   :  { %s1551_s2 = sld [smem:[#allocation7 + $0x208]]  ;;  %v432_v13 = vstv %s2487_s1 }
 0x131   :  { %s2492_s29 = sld [smem:[#allocation52_spill]]  ;;  %v1593_v23 = vmul.f32 %v432_v13, %v1526_v53  ;;  %v503_v13 = vstv %s1333_s13 }
 0x132   :  { %2488 = sst [smem:[#allocation30_spill]] %s1542_s15 }
 0x133   :  { %s2493_s8 = sld [smem:[#allocation53_spill]]  ;;  %v435_v16 = vstv %s2489_s20 }
 0x134   :  { %s1558_s15 = sld [smem:[#allocation7 + $0x209]]  ;;  %v438_v17 = vstv %s2490_s30  ;;  %v1600_v26 = vmul.f32 %v435_v16, %v1528_v54 }
 0x135   :  { %s2495_s4 = sld [smem:[#allocation54_spill]]  ;;  %v1603_v27 = vmul.f32 %v438_v17, %v1532_v57 }
 0x136   :  { %2491 = sst [smem:[#allocation36_spill]] %s1551_s2  ;;  %2507 = vst [vmem:[#allocation74_spill] sm:$0xff] %v1600_v26 }
 0x137   :  { %s2496_s3 = sld [smem:[#allocation55_spill]]  ;;  %v441_v20 = vstv %s2492_s29  ;;  %2508 = vst [vmem:[#allocation75_spill] sm:$0xff] %v1603_v27 }
 0x138   :  { %s1569_s2 = sld [smem:[#allocation7 + $0x20a]]  ;;  %v1610_v30 = vmul.f32 %v441_v20, %v1538_v61  ;;  %v1693_v20 = vmul.f32 %v494_v55, %v1544_v2  ;;  %v535_v55 = vstv %s1371_s0 }
 0x139   :  { %s2498_s19 = sld [smem:[#allocation56_spill]]  ;;  %v444_v21 = vstv %s2493_s8 }
 0x13a   :  { %2494 = sst [smem:[#allocation37_spill]] %s1558_s15  ;;  %2512 = vst [vmem:[#allocation76_spill] sm:$0xff] %v1610_v30  ;;  %v1613_v31 = vmul.f32 %v444_v21, %v1544_v2  ;;  %2532 = vst [vmem:[#allocation87_spill] sm:$0xff] %v1693_v20  ;;  %v509_v21 = vstv %s1337_s22 }
 0x13b   :  { %s2499_s11 = sld [smem:[#allocation57_spill]]  ;;  %v447_v24 = vstv %s2495_s4 }
 0x13c   :  { %s1578_s15 = sld [smem:[#allocation7 + $0x20b]]  ;;  %2513 = vst [vmem:[#allocation77_spill] sm:$0xff] %v1613_v31  ;;  %v1620_v34 = vmul.f32 %v447_v24, %v1546_v3  ;;  %v513_v24 = vstv %s1339_s7 }
 0x13d   :  { %s2501_s1 = sld [smem:[#allocation58_spill]]  ;;  %v450_v25 = vstv %s2496_s3 }
 0x13e   :  { %2497 = sst [smem:[#allocation38_spill]] %s1569_s2  ;;  %2516 = vst [vmem:[#allocation78_spill] sm:$0xff] %v1620_v34  ;;  %v1623_v35 = vmul.f32 %v450_v25, %v1548_v4 }
 0x13f   :  { %s2502_s2 = sld [smem:[#allocation59_spill]]  ;;  %v453_v28 = vstv %s2498_s19 }
 0x140   :  { %s1588_s9 = sld [smem:[#allocation7 + $0x20c]]  ;;  %2517 = vst [vmem:[#allocation79_spill] sm:$0xff] %v1623_v35  ;;  %v1630_v38 = vmul.f32 %v453_v28, %v1560_v10 }
 0x141   :  { %s2504_s20 = sld [smem:[#allocation60_spill]]  ;;  %v456_v29 = vstv %s2499_s11 }
 0x142   :  { %2500 = sst [smem:[#allocation39_spill]] %s1578_s15  ;;  %2521 = vst [vmem:[#allocation80_spill] sm:$0xff] %v1630_v38  ;;  %v1633_v39 = vmul.f32 %v456_v29, %v1571_v14  ;;  %v517_v29 = vstv %s1341_s17 }
 0x143   :  { %s2505_s30 = sld [smem:[#allocation61_spill]]  ;;  %v459_v32 = vstv %s2501_s1 }
 0x144   :  { %s1597_s15 = sld [smem:[#allocation7 + $0x20d]]  ;;  %2522 = vst [vmem:[#allocation81_spill] sm:$0xff] %v1633_v39  ;;  %v1640_v45 = vmul.f32 %v459_v32, %v1590_v22  ;;  %v520_v32 = vstv %s1343_s6 }
 0x145   :  { %s2509_s29 = sld [smem:[#allocation62_spill]]  ;;  %v463_v33 = vstv %s2502_s2 }
 0x146   :  { %2503 = sst [smem:[#allocation40_spill]] %s1588_s9  ;;  %2524 = vst [vmem:[#allocation82_spill] sm:$0xff] %v1640_v45  ;;  %v1643_v0 = vmul.f32 %v463_v33, %v1425_v46  ;;  %v1710_v33 = vmul.f32 %v503_v13, %v1560_v10 }
 0x147   :  { %s2510_s8 = sld [smem:[#allocation63_spill]]  ;;  %v467_v36 = vstv %s2504_s20 }
 0x148   :  { %s1607_s9 = sld [smem:[#allocation7 + $0x20e]]  ;;  %v1650_v48 = vmul.f32 %v467_v36, %v1427_v47  ;;  %2535 = vst [vmem:[#allocation90_spill] sm:$0xff] %v1710_v33 }
 0x149   :  { %s2514_s4 = sld [smem:[#allocation64_spill]]  ;;  %v470_v37 = vstv %s2505_s30 }
 0x14a   :  { %2506 = sst [smem:[#allocation41_spill]] %s1597_s15  ;;  %v1653_v51 = vmul.f32 %v470_v37, %v1507_v40  ;;  %v523_v37 = vstv %s1355_s21 }
 0x14b   :  { %s2515_s3 = sld [smem:[#allocation65_spill]]  ;;  %v473_v42 = vstv %s2509_s29 }
 0x14c   :  { %s1617_s15 = sld [smem:[#allocation7 + $0x20f]]  ;;  %v1660_v58 = vmul.f32 %v473_v42, %v1510_v41  ;;  %v526_v42 = vstv %s1361_s18 }
 0x14d   :  { %s2518_s19 = sld [smem:[#allocation66_spill]]  ;;  %v476_v43 = vstv %s2510_s8  ;;  %v1743_v13 = vmul.f32 %v526_v42, %v1515_v44  ;;  %v1760_v42 = vmul.f32 %v535_v55, %v1528_v54 }
 0x14e   :  { %2511 = sst [smem:[#allocation42_spill]] %s1607_s9  ;;  %v1663_v59 = vmul.f32 %v476_v43, %v1515_v44  ;;  %v1720_v43 = vmul.f32 %v509_v21, %v1590_v22  ;;  %v544_v21 = vstv %s1385_s25 }
 0x14f   :  { %s2519_s11 = sld [smem:[#allocation67_spill]]  ;;  %v479_v1 = vstv %s2514_s4  ;;  %2546 = vst [vmem:[#allocation95_spill] sm:$0xff] %v1760_v42 }
 0x150   :  { %s1627_s9 = sld [smem:[#allocation7 + $0x280]]  ;;  %v1670_v62 = vmul.f32 %v479_v1, %v1524_v52  ;;  %2537 = vst [vmem:[#allocation92_spill] sm:$0xff] %v1720_v43  ;;  %v1723_v1 = vmul.f32 %v513_v24, %v1425_v46 }
 0x151   :  { %s2523_s2 = sld [smem:[#allocation68_spill]]  ;;  %v482_v50 = vstv %s2515_s3 }
 0x152   :  { %s1637_s1 = sld [smem:[#allocation7 + $0x281]]  ;;  %v1673_v63 = vmul.f32 %v482_v50, %v1526_v53  ;;  %v529_v50 = vstv %s1363_s23 }
 0x153   :  { %s2525_s20 = sld [smem:[#allocation69_spill]]  ;;  %v485_v49 = vstv %s2518_s19  ;;  %v1750_v24 = vmul.f32 %v529_v50, %v1524_v52 }
 0x154   :  { %s2526_s30 = sld [smem:[#allocation70_spill]]  ;;  %2528 = vst [vmem:[#allocation83_spill] sm:$0xff] %v1673_v63  ;;  %v1680_v8 = vmul.f32 %v485_v49, %v1528_v54  ;;  %v532_v49 = vstv %s1365_s14 }
 0x155   :  { %s2527_s29 = sld [smem:[#allocation71_spill]]  ;;  %v488_v56 = vstv %s2519_s11  ;;  %2542 = vst [vmem:[#allocation93_spill] sm:$0xff] %v1750_v24 }
 0x156   :  { %2520 = sst [smem:[#allocation43_spill]] %s1627_s9  ;;  %2529 = vst [vmem:[#allocation84_spill] sm:$0xff] %v1680_v8  ;;  %v1683_v9 = vmul.f32 %v488_v56, %v1532_v57  ;;  %v1730_v56 = vmul.f32 %v517_v29, %v1427_v47  ;;  %v1753_v29 = vmul.f32 %v532_v49, %v1526_v53  ;;  %v1773_v49 = vmul.f32 %v544_v21, %v1544_v2 }
 0x157   :  { %s1647_s9 = sld [smem:[#allocation7 + $0x282]]  ;;  %v491_v60 = vstv %s2523_s2 }
 0x158   :  { %s1657_s8 = sld [smem:[#allocation7 + $0x283]]  ;;  %2530 = vst [vmem:[#allocation85_spill] sm:$0xff] %v1683_v9  ;;  %v1690_v17 = vmul.f32 %v491_v60, %v1538_v61  ;;  %v1733_v60 = vmul.f32 %v520_v32, %v1507_v40  ;;  %2543 = vst [vmem:[#allocation94_spill] sm:$0xff] %v1753_v29  ;;  %v547_v32 = vstv %s1389_s26 }
 0x159   :  { %s1667_s4 = sld [smem:[#allocation7 + $0x284]]  ;;  %v497_v5 = vstv %s2525_s20  ;;  %2550 = vst [vmem:[#allocation98_spill] sm:$0xff] %v1773_v49  ;;  %v1780_v55 = vmul.f32 %v547_v32, %v1546_v3  ;;  %v582_v32 = vstv %s1446_s12 }
 0x15a   :  { %v500_v6 = vstv %s2526_s30  ;;  %s1677_s3 = sld [smem:[#allocation7 + $0x285]]  ;;  %2531 = vst [vmem:[#allocation86_spill] sm:$0xff] %v1690_v17  ;;  %v1700_v25 = vmul.f32 %v497_v5, %v1546_v3  ;;  %v538_v5 = vstv %s1374_s24 }
 0x15b   :  { %v506_v16 = vstv %s2527_s29  ;;  %s1687_s16 = sld [smem:[#allocation7 + $0x286]]  ;;  %v1703_v28 = vmul.f32 %v500_v6, %v1548_v4  ;;  %v1740_v6 = vmul.f32 %v523_v37, %v1510_v41  ;;  %v550_v37 = vstv %s1395_s27  ;;  %2553 = vst [vmem:[#allocation99_spill] sm:$0xff] %v1780_v55 }
 0x15c   :  { %s1697_s19 = sld [smem:[#allocation7 + $0x287]]  ;;  %2533 = vst [vmem:[#allocation88_spill] sm:$0xff] %v1700_v25  ;;  %v1713_v36 = vmul.f32 %v506_v16, %v1571_v14  ;;  %v541_v16 = vstv %s1379_s5  ;;  %v1763_v43 = vmul.f32 %v538_v5, %v1532_v57  ;;  %v1783_v5 = vmul.f32 %v550_v37, %v1548_v4 }
 0x15d   :  { %2534 = vst [vmem:[#allocation89_spill] sm:$0xff] %v1703_v28  ;;  %s1707_s13 = sld [smem:[#allocation7 + $0x288]]  ;;  %v1770_v50 = vmul.f32 %v541_v16, %v1538_v61 }
 0x15e   :  { %2536 = vst [vmem:[#allocation91_spill] sm:$0xff] %v1713_v36  ;;  %s1717_s7 = sld [smem:[#allocation7 + $0x289]]  ;;  %2547 = vst [vmem:[#allocation96_spill] sm:$0xff] %v1763_v43 }
 0x15f   :  { %s1727_s6 = sld [smem:[#allocation7 + $0x28a]]  ;;  %2549 = vst [vmem:[#allocation97_spill] sm:$0xff] %v1770_v50  ;;  %2554 = vst [vmem:[#allocation100_spill] sm:$0xff] %v1783_v5 }
 0x160   :  { %s2538_s17 = sld [smem:[#allocation72_spill]]  ;;  %v679_v8 = vstv %s1677_s3 }
 0x161   :  { %s2539_s21 = sld [smem:[#allocation73_spill]] }
 0x162   :  { %s1737_s22 = sld [smem:[#allocation7 + $0x28b]] }
 0x163   :  { %s2540_s18 = sld [smem:[#allocation14_spill]] }
 0x164   :  { %s2541_s23 = sld [smem:[#allocation31_spill]] }
 0x165   :  { %s1747_s14 = sld [smem:[#allocation7 + $0x28c]] }
 0x166   :  { %s2544_s0 = sld [smem:[#allocation32_spill]]  ;;  %v553_v45 = vstv %s2538_s17 }
 0x167   :  { %s2545_s24 = sld [smem:[#allocation15_spill]]  ;;  %v556_v36 = vstv %s2539_s21  ;;  %v1790_v21 = vmul.f32 %v553_v45, %v1560_v10 }
 0x168   :  { %s1757_s11 = sld [smem:[#allocation7 + $0x28d]]  ;;  %v1793_v28 = vmul.f32 %v556_v36, %v1571_v14 }
 0x169   :  { %s2548_s5 = sld [smem:[#allocation16_spill]]  ;;  %v559_v39 = vstv %s2540_s18  ;;  %2556 = vst [vmem:[#allocation101_spill] sm:$0xff] %v1790_v21 }
 0x16a   :  { %s1767_s25 = sld [smem:[#allocation7 + $0x28e]]  ;;  %v563_v33 = vstv %s2541_s23  ;;  %2557 = vst [vmem:[#allocation102_spill] sm:$0xff] %v1793_v28  ;;  %v1802_v37 = vmul.f32 %v559_v39, %v1590_v22  ;;  %v585_v39 = vstv %s1452_s10 }
 0x16b   :  { %s2551_s26 = sld [smem:[#allocation33_spill]]  ;;  %v1805_v5 = vmul.f32 %v563_v33, %v1425_v46  ;;  %v1843_v20 = vmul.f32 %v585_v39, %v1528_v54  ;;  %v700_v29 = vstv %s1747_s14 }
 0x16c   :  { %s2552_s27 = sld [smem:[#allocation17_spill]]  ;;  %v567_v38 = vstv %s2544_s0  ;;  %2561 = vst [vmem:[#allocation103_spill] sm:$0xff] %v1802_v37  ;;  %v588_v37 = vstv %s1458_s28 }
 0x16d   :  { %s1777_s2 = sld [smem:[#allocation7 + $0x28f]]  ;;  %v570_v16 = vstv %s2545_s24  ;;  %v1812_v28 = vmul.f32 %v567_v38, %v1427_v47  ;;  %2574 = vst [vmem:[#allocation106_spill] sm:$0xff] %v1843_v20 }
 0x16e   :  { %s1787_s20 = sld [smem:[#allocation7 + $0x300]]  ;;  %v1815_v21 = vmul.f32 %v570_v16, %v1507_v40  ;;  %v703_v26 = vstv %s1757_s11 }
 0x16f   :  { %s2558_s30 = sld [smem:[#allocation18_spill]]  ;;  %v573_v35 = vstv %s2548_s5 }
 0x170   :  { %s2560_s18 = sld [smem:[#allocation19_spill]]  ;;  %v1822_v33 = vmul.f32 %v573_v35, %v1510_v41  ;;  %v1840_v35 = vmul.f32 %v582_v32, %v1526_v53 }
 0x171   :  { %s1799_s23 = sld [smem:[#allocation7 + $0x301]]  ;;  %v576_v45 = vstv %s2551_s26 }
 0x172   :  { %s2562_s0 = sld [smem:[#allocation20_spill]]  ;;  %v579_v36 = vstv %s2552_s27  ;;  %v1830_v38 = vmul.f32 %v576_v45, %v1515_v44  ;;  %2573 = vst [vmem:[#allocation105_spill] sm:$0xff] %v1840_v35  ;;  %v670_v35 = vstv %s1647_s9 }
 0x173   :  { %s2563_s24 = sld [smem:[#allocation21_spill]]  ;;  %v1833_v16 = vmul.f32 %v579_v36, %v1524_v52  ;;  %v1850_v36 = vmul.f32 %v588_v37, %v1532_v57 }
 0x174   :  { %2555 = sst [smem:[#allocation44_spill]] %s1787_s20 }
 0x175   :  { %s1809_s20 = sld [smem:[#allocation7 + $0x302]]  ;;  %v591_v55 = vstv %s2558_s30  ;;  %2569 = vst [vmem:[#allocation104_spill] sm:$0xff] %v1833_v16  ;;  %2578 = vst [vmem:[#allocation107_spill] sm:$0xff] %v1850_v36 }
 0x176   :  { %s2564_s5 = sld [smem:[#allocation22_spill]]  ;;  %v594_v25 = vstv %s2560_s18  ;;  %v1853_v31 = vmul.f32 %v591_v55, %v1538_v61 }
 0x177   :  { %s2565_s29 = sld [smem:[#allocation34_spill]]  ;;  %v1856_v32 = vmul.f32 %v594_v25, %v1544_v2  ;;  %v717_v16 = vstv %s1799_s23 }
 0x178   :  { %s1819_s17 = sld [smem:[#allocation7 + $0x303]]  ;;  %v597_v49 = vstv %s2562_s0  ;;  %2580 = vst [vmem:[#allocation108_spill] sm:$0xff] %v1853_v31 }
 0x179   :  { %s2567_s26 = sld [smem:[#allocation23_spill]]  ;;  %v600_v34 = vstv %s2563_s24  ;;  %2582 = vst [vmem:[#allocation109_spill] sm:$0xff] %v1856_v32  ;;  %v1862_v17 = vmul.f32 %v597_v49, %v1546_v3 }
 0x17a   :  { %s1827_s27 = sld [smem:[#allocation7 + $0x304]]  ;;  %v1865_v43 = vmul.f32 %v600_v34, %v1548_v4 }
 0x17b   :  { %s2570_s12 = sld [smem:[#allocation24_spill]]  ;;  %2585 = vst [vmem:[#allocation110_spill] sm:$0xff] %v1862_v17 }
 0x17c   :  { %s2571_s10 = sld [smem:[#allocation25_spill]]  ;;  %v603_v50 = vstv %s2564_s5  ;;  %2586 = vst [vmem:[#allocation111_spill] sm:$0xff] %v1865_v43 }
 0x17d   :  { %s1837_s21 = sld [smem:[#allocation7 + $0x305]]  ;;  %v606_v45 = vstv %s2565_s29  ;;  %v1872_v55 = vmul.f32 %v603_v50, %v1560_v10 }
 0x17e   :  { %2566 = sst [smem:[#allocation45_spill]] %s1819_s17  ;;  %v1875_v25 = vmul.f32 %v606_v45, %v1571_v14 }
 0x17f   :  { %s2575_s28 = sld [smem:[#allocation26_spill]]  ;;  %v609_v39 = vstv %s2567_s26  ;;  %2589 = vst [vmem:[#allocation112_spill] sm:$0xff] %v1872_v55 }
 0x180   :  { %2568 = sst [smem:[#allocation46_spill]] %s1827_s27  ;;  %2590 = vst [vmem:[#allocation113_spill] sm:$0xff] %v1875_v25  ;;  %v1882_v34 = vmul.f32 %v609_v39, %v1590_v22 }
 0x181   :  { %s2576_s30 = sld [smem:[#allocation27_spill]]  ;;  %v613_v37 = vstv %s2570_s12 }
 0x182   :  { %s1847_s18 = sld [smem:[#allocation7 + $0x306]]  ;;  %v617_v36 = vstv %s2571_s10  ;;  %2594 = vst [vmem:[#allocation114_spill] sm:$0xff] %v1882_v34  ;;  %v1890_v50 = vmul.f32 %v613_v37, %v1425_v46 }
 0x183   :  { %2572 = sst [smem:[#allocation47_spill]] %s1837_s21  ;;  %v1893_v45 = vmul.f32 %v617_v36, %v1427_v47 }
 0x184   :  { %s2579_s0 = sld [smem:[#allocation28_spill]] }
 0x185   :  { %s2581_s24 = sld [smem:[#allocation35_spill]]  ;;  %v620_v32 = vstv %s2575_s28 }
 0x186   :  { %s2583_s21 = sld [smem:[#allocation29_spill]]  ;;  %v1900_v39 = vmul.f32 %v620_v32, %v1507_v40 }
 0x187   :  { %s1859_s27 = sld [smem:[#allocation7 + $0x307]]  ;;  %v623_v49 = vstv %s2576_s30 }
 0x188   :  { %2577 = sst [smem:[#allocation48_spill]] %s1847_s18  ;;  %v1903_v34 = vmul.f32 %v623_v49, %v1510_v41 }
 0x189   :  { %s2587_s5 = sld [smem:[#allocation30_spill]] }
 0x18a   :  { %s2588_s29 = sld [smem:[#allocation36_spill]]  ;;  %v626_v43 = vstv %s2579_s0 }
 0x18b   :  { %s1869_s18 = sld [smem:[#allocation7 + $0x308]]  ;;  %v629_v17 = vstv %s2581_s24  ;;  %v1910_v36 = vmul.f32 %v626_v43, %v1515_v44 }
 0x18c   :  { %s2591_s26 = sld [smem:[#allocation37_spill]]  ;;  %v632_v31 = vstv %s2583_s21  ;;  %v1913_v20 = vmul.f32 %v629_v17, %v1524_v52 }
 0x18d   :  { %2584 = sst [smem:[#allocation49_spill]] %s1859_s27  ;;  %2599 = vst [vmem:[#allocation115_spill] sm:$0xff] %v1910_v36  ;;  %v1916_v32 = vmul.f32 %v632_v31, %v1526_v53 }
 0x18e   :  { %s2592_s27 = sld [smem:[#allocation38_spill]]  ;;  %2601 = vst [vmem:[#allocation116_spill] sm:$0xff] %v1913_v20  ;;  %v694_v20 = vstv %s1727_s6 }
 0x18f   :  { %s1879_s17 = sld [smem:[#allocation7 + $0x309]]  ;;  %v635_v25 = vstv %s2587_s5  ;;  %2602 = vst [vmem:[#allocation117_spill] sm:$0xff] %v1916_v32 }
 0x190   :  { %s2595_s12 = sld [smem:[#allocation39_spill]]  ;;  %v638_v55 = vstv %s2588_s29  ;;  %v1922_v9 = vmul.f32 %v635_v25, %v1528_v54  ;;  %v659_v25 = vstv %s1617_s15 }
 0x191   :  { %s1887_s10 = sld [smem:[#allocation7 + $0x30a]]  ;;  %v1925_v42 = vmul.f32 %v638_v55, %v1532_v57 }
 0x192   :  { %s2596_s28 = sld [smem:[#allocation40_spill]]  ;;  %v641_v30 = vstv %s2591_s26  ;;  %2603 = vst [vmem:[#allocation118_spill] sm:$0xff] %v1922_v9  ;;  %v667_v9 = vstv %s1637_s1 }
 0x193   :  { %s2597_s30 = sld [smem:[#allocation41_spill]]  ;;  %2604 = vst [vmem:[#allocation119_spill] sm:$0xff] %v1925_v42  ;;  %v1932_v17 = vmul.f32 %v641_v30, %v1538_v61 }
 0x194   :  { %s2598_s21 = sld [smem:[#allocation42_spill]]  ;;  %v644_v37 = vstv %s2592_s27 }
 0x195   :  { %2593 = sst [smem:[#allocation50_spill]] %s1879_s17  ;;  %2605 = vst [vmem:[#allocation120_spill] sm:$0xff] %v1932_v17  ;;  %v1935_v31 = vmul.f32 %v644_v37, %v1544_v2  ;;  %v676_v17 = vstv %s1667_s4 }
 0x196   :  { %s1897_s17 = sld [smem:[#allocation7 + $0x30b]]  ;;  %v647_v49 = vstv %s2595_s12 }
 0x197   :  { %s1907_s0 = sld [smem:[#allocation7 + $0x30c]]  ;;  %2606 = vst [vmem:[#allocation121_spill] sm:$0xff] %v1935_v31  ;;  %v1942_v55 = vmul.f32 %v647_v49, %v1546_v3  ;;  %v673_v31 = vstv %s1657_s8 }
 0x198   :  { %s2600_s24 = sld [smem:[#allocation43_spill]]  ;;  %v650_v43 = vstv %s2596_s28 }
 0x199   :  { %s1919_s5 = sld [smem:[#allocation7 + $0x30d]]  ;;  %v653_v27 = vstv %s2597_s30  ;;  %2607 = vst [vmem:[#allocation122_spill] sm:$0xff] %v1942_v55  ;;  %v1950_v30 = vmul.f32 %v650_v43, %v1548_v4  ;;  %v1963_v55 = vmul.f32 %v659_v25, %v1590_v22  ;;  %v682_v43 = vstv %s1687_s16 }
 0x19a   :  { %s1929_s27 = sld [smem:[#allocation7 + $0x30e]]  ;;  %v656_v32 = vstv %s2598_s21  ;;  %v1953_v37 = vmul.f32 %v653_v27, %v1560_v10  ;;  %v685_v25 = vstv %s1697_s19 }
 0x19b   :  { %s1939_s29 = sld [smem:[#allocation7 + $0x30f]]  ;;  %2608 = vst [vmem:[#allocation123_spill] sm:$0xff] %v1950_v30  ;;  %v1960_v49 = vmul.f32 %v656_v32, %v1571_v14  ;;  %2611 = vst [vmem:[#allocation126_spill] sm:$0xff] %v1963_v55  ;;  %v1976_v32 = vmul.f32 %v670_v35, %v1507_v40  ;;  %v1982_v55 = vmul.f32 %v673_v31, %v1510_v41  ;;  %v691_v30 = vstv %s1717_s7 }
 0x19c   :  { %s1947_s26 = sld [smem:[#allocation7 + $0x380]]  ;;  %2609 = vst [vmem:[#allocation124_spill] sm:$0xff] %v1953_v37  ;;  %v1973_v37 = vmul.f32 %v667_v9, %v1427_v47  ;;  %v1992_v9 = vmul.f32 %v679_v8, %v1524_v52  ;;  %v1995_v35 = vmul.f32 %v682_v43, %v1526_v53  ;;  %v697_v31 = vstv %s1737_s22 }
 0x19d   :  { %s1957_s15 = sld [smem:[#allocation7 + $0x381]]  ;;  %2610 = vst [vmem:[#allocation125_spill] sm:$0xff] %v1960_v49  ;;  %v1985_v49 = vmul.f32 %v676_v17, %v1515_v44  ;;  %v2002_v17 = vmul.f32 %v685_v25, %v1528_v54  ;;  %v2013_v43 = vmul.f32 %v691_v30, %v1538_v61  ;;  %v2020_v25 = vmul.f32 %v694_v20, %v1544_v2 }
 0x19e   :  { %v663_v42 = vstv %s2600_s24  ;;  %s1967_s9 = sld [smem:[#allocation7 + $0x382]]  ;;  %2614 = vst [vmem:[#allocation128_spill] sm:$0xff] %v1992_v9  ;;  %2615 = vst [vmem:[#allocation129_spill] sm:$0xff] %v1995_v35  ;;  %v709_v35 = vstv %s1777_s2  ;;  %v2030_v30 = vmul.f32 %v700_v29, %v1548_v4  ;;  %v747_v63 = vstv %s1897_s17 }
 0x19f   :  { %v1970_v27 = vmul.f32 %v663_v42, %v1425_v46  ;;  %s1979_s1 = sld [smem:[#allocation7 + $0x383]]  ;;  %2612 = vst [vmem:[#allocation127_spill] sm:$0xff] %v1985_v49  ;;  %v688_v42 = vstv %s1707_s13  ;;  %2616 = vst [vmem:[#allocation130_spill] sm:$0xff] %v2002_v17  ;;  %v706_v49 = vstv %s1767_s25  ;;  %v2023_v17 = vmul.f32 %v697_v31, %v1546_v3 }
 0x1a0   :  { %s2613_s8 = sld [smem:[#allocation44_spill]]  ;;  %v2010_v8 = vmul.f32 %v688_v42, %v1532_v57  ;;  %2619 = vst [vmem:[#allocation132_spill] sm:$0xff] %v2013_v43  ;;  %2622 = vst [vmem:[#allocation133_spill] sm:$0xff] %v2020_v25  ;;  %v720_v42 = vstv %s1809_s20  ;;  %v2033_v43 = vmul.f32 %v703_v26, %v1560_v10  ;;  %v2036_v20 = vmul.f32 %v706_v49, %v1571_v14 }
 0x1a1   :  { %s1989_s4 = sld [smem:[#allocation7 + $0x384]]  ;;  %2623 = vst [vmem:[#allocation134_spill] sm:$0xff] %v2023_v17  ;;  %2626 = vst [vmem:[#allocation135_spill] sm:$0xff] %v2030_v30  ;;  %v2042_v17 = vmul.f32 %v709_v35, %v1590_v22  ;;  %v2052_v26 = vmul.f32 %v717_v16, %v1427_v47  ;;  %v2055_v49 = vmul.f32 %v720_v42, %v1507_v40  ;;  %v750_v36 = vstv %s1907_s0 }
 0x1a2   :  { %s1999_s3 = sld [smem:[#allocation7 + $0x385]]  ;;  %2618 = vst [vmem:[#allocation131_spill] sm:$0xff] %v2010_v8  ;;  %2627 = vst [vmem:[#allocation136_spill] sm:$0xff] %v2033_v43  ;;  %v744_v8 = vstv %s1887_s10  ;;  %v753_v24 = vstv %s1919_s5 }
 0x1a3   :  { %s2617_s16 = sld [smem:[#allocation45_spill]]  ;;  %2629 = vst [vmem:[#allocation137_spill] sm:$0xff] %v2036_v20  ;;  %2630 = vst [vmem:[#allocation138_spill] sm:$0xff] %v2042_v17  ;;  %v738_v17 = vstv %s1869_s18 }
 0x1a4   :  { %s2007_s19 = sld [smem:[#allocation7 + $0x386]] }
 0x1a5   :  { %s2620_s13 = sld [smem:[#allocation46_spill]] }
 0x1a6   :  { %s2621_s7 = sld [smem:[#allocation47_spill]]  ;;  %v713_v9 = vstv %s2613_s8 }
 0x1a7   :  { %s2017_s6 = sld [smem:[#allocation7 + $0x387]]  ;;  %v2045_v25 = vmul.f32 %v713_v9, %v1425_v46 }
 0x1a8   :  { %s2624_s22 = sld [smem:[#allocation48_spill]] }
 0x1a9   :  { %s2625_s14 = sld [smem:[#allocation49_spill]]  ;;  %v723_v31 = vstv %s2617_s16 }
 0x1aa   :  { %s2027_s11 = sld [smem:[#allocation7 + $0x388]]  ;;  %v2062_v9 = vmul.f32 %v723_v31, %v1510_v41 }
 0x1ab   :  { %s2628_s25 = sld [smem:[#allocation50_spill]]  ;;  %v726_v29 = vstv %s2620_s13 }
 0x1ac   :  { %s2039_s2 = sld [smem:[#allocation7 + $0x389]]  ;;  %v729_v30 = vstv %s2621_s7  ;;  %2631 = vst [vmem:[#allocation139_spill] sm:$0xff] %v2062_v9  ;;  %v2070_v16 = vmul.f32 %v726_v29, %v1515_v44  ;;  %v756_v29 = vstv %s1929_s27 }
 0x1ad   :  { %s2049_s20 = sld [smem:[#allocation7 + $0x38a]]  ;;  %v2073_v42 = vmul.f32 %v729_v30, %v1524_v52  ;;  %v2090_v30 = vmul.f32 %v738_v17, %v1532_v57  ;;  %v763_v17 = vstv %s1947_s26 }
 0x1ae   :  { %v732_v20 = vstv %s2624_s22  ;;  %s2059_s23 = sld [smem:[#allocation7 + $0x38b]]  ;;  %2632 = vst [vmem:[#allocation140_spill] sm:$0xff] %v2070_v16 }
 0x1af   :  { %v735_v35 = vstv %s2625_s14  ;;  %s2067_s12 = sld [smem:[#allocation7 + $0x38c]]  ;;  %2633 = vst [vmem:[#allocation141_spill] sm:$0xff] %v2073_v42  ;;  %v2080_v31 = vmul.f32 %v732_v20, %v1526_v53  ;;  %2636 = vst [vmem:[#allocation144_spill] sm:$0xff] %v2090_v30  ;;  %v2096_v20 = vmul.f32 %v744_v8, %v1544_v2  ;;  %v767_v30 = vstv %s1957_s15 }
 0x1b0   :  { %s2077_s28 = sld [smem:[#allocation7 + $0x38d]]  ;;  %v2083_v9 = vmul.f32 %v735_v35, %v1528_v54  ;;  %v759_v35 = vstv %s1939_s29  ;;  %v2115_v8 = vmul.f32 %v756_v29, %v1571_v14  ;;  %v2133_v29 = vmul.f32 %v767_v30, %v1427_v47 }
 0x1b1   :  { %v741_v43 = vstv %s2628_s25  ;;  %2634 = vst [vmem:[#allocation142_spill] sm:$0xff] %v2080_v31  ;;  %s2087_s18 = sld [smem:[#allocation7 + $0x38e]]  ;;  %2638 = vst [vmem:[#allocation146_spill] sm:$0xff] %v2096_v20  ;;  %v2105_v31 = vmul.f32 %v750_v36, %v1548_v4  ;;  %v770_v20 = vstv %s1967_s9  ;;  %v2122_v36 = vmul.f32 %v759_v35, %v1590_v22 }
 0x1b2   :  { %2635 = vst [vmem:[#allocation143_spill] sm:$0xff] %v2083_v9  ;;  %v2093_v42 = vmul.f32 %v741_v43, %v1538_v61  ;;  %s2099_s17 = sld [smem:[#allocation7 + $0x38f]]  ;;  %v2102_v9 = vmul.f32 %v747_v63, %v1546_v3  ;;  %v2112_v43 = vmul.f32 %v753_v24, %v1560_v10  ;;  %2642 = vst [vmem:[#allocation150_spill] sm:$0xff] %v2115_v8  ;;  %v773_v63 = vstv %s1979_s1 }
 0x1b3   :  { %2640 = vst [vmem:[#allocation148_spill] sm:$0xff] %v2105_v31  ;;  %s2109_s10 = sld [smem:[#allocation8]]  ;;  %2643 = vst [vmem:[#allocation151_spill] sm:$0xff] %v2122_v36  ;;  %v776_v31 = vstv %s1989_s4  ;;  %v2130_v24 = vmul.f32 %v763_v17, %v1425_v46  ;;  %v785_v8 = vstv %s2017_s6  ;;  %v2140_v35 = vmul.f32 %v770_v20, %v1507_v40 }
 0x1b4   :  { %2637 = vst [vmem:[#allocation145_spill] sm:$0xff] %v2093_v42  ;;  %2639 = vst [vmem:[#allocation147_spill] sm:$0xff] %v2102_v9  ;;  %s2119_s30 = sld [smem:[#allocation8 + $0x1]]  ;;  %v779_v9 = vstv %s1999_s3  ;;  %v782_v42 = vstv %s2007_s19  ;;  %v2143_v36 = vmul.f32 %v773_v63, %v1510_v41  ;;  %v791_v16 = vstv %s2039_s2 }
 0x1b5   :  { %2641 = vst [vmem:[#allocation149_spill] sm:$0xff] %v2112_v43  ;;  %s2127_s21 = sld [smem:[#allocation8 + $0x2]]  ;;  %v788_v43 = vstv %s2027_s11  ;;  %v794_v46 = vstv %s2049_s20  ;;  %v2150_v47 = vmul.f32 %v776_v31, %v1515_v44  ;;  %v2153_v30 = vmul.f32 %v779_v9, %v1524_v52 }
 0x1b6   :  { %s2137_s0 = sld [smem:[#allocation8 + $0x3]]  ;;  %v2156_v17 = vmul.f32 %v782_v42, %v1526_v53  ;;  %v797_v40 = vstv %s2059_s23  ;;  %v2162_v41 = vmul.f32 %v785_v8, %v1528_v54  ;;  %v2165_v20 = vmul.f32 %v788_v43, %v1532_v57 }
 0x1b7   :  { %s2147_s24 = sld [smem:[#allocation8 + $0x4]]  ;;  %v800_v44 = vstv %s2067_s12  ;;  %v803_v31 = vstv %s2077_s28  ;;  %v2173_v53 = vmul.f32 %v791_v16, %v1538_v61  ;;  %v2176_v9 = vmul.f32 %v794_v46, %v1544_v2 }
 0x1b8   :  { %s2159_s5 = sld [smem:[#allocation8 + $0x5]]  ;;  %2644 = vst [vmem:[#allocation152_spill] sm:$0xff] %v2165_v20  ;;  %v806_v42 = vstv %s2087_s18  ;;  %v2184_v43 = vmul.f32 %v797_v40, %v1546_v3  ;;  %v809_v8 = vstv %s2099_s17  ;;  %v2190_v61 = vmul.f32 %v800_v44, %v1548_v4 }
 0x1b9   :  { %s2169_s27 = sld [smem:[#allocation8 + $0x6]]  ;;  %v415_v52 = vstv %s2109_s10  ;;  %v2193_v2 = vmul.f32 %v803_v31, %v1560_v10  ;;  %v2199_v3 = vmul.f32 %v806_v42, %v1571_v14  ;;  %v2205_v4 = vmul.f32 %v809_v8, %v1590_v22  ;;  %v2645_v8 = vld [vmem:[#allocation93_spill] sm:$0xff] }
 0x1ba   :  { %s2179_s29 = sld [smem:[#allocation8 + $0x7]]  ;;  %v416_v54 = vadd.f32 %v415_v52, %v1554_v7  ;;  %v465_v57 = vstv %s2119_s30 }
 0x1bb   :  { %v466_v63 = vadd.f32 %v465_v57, %v1643_v0  ;;  %v515_v20 = vstv %s2127_s21  ;;  %s2295_s26 = sld [smem:[#allocation10]] }
 0x1bc   :  { %v419_v16 = vadd.f32 %v1563_v11, %v416_v54  ;;  %v516_v7 = vadd.f32 %v515_v20, %v1723_v1  ;;  %v565_v46 = vstv %s2137_s0  ;;  %s2301_s15 = sld [smem:[#allocation10 + $0x1]] }
 0x1bd   :  { %v469_v40 = vadd.f32 %v1650_v48, %v466_v63  ;;  %v566_v0 = vadd.f32 %v565_v46, %v1805_v5  ;;  %v615_v52 = vstv %s2147_s24  ;;  %v2646_v63 = vld [vmem:[#allocation115_spill] sm:$0xff]  ;;  %v2649_v46 = vld [vmem:[#allocation104_spill] sm:$0xff]  ;;  %s2307_s9 = sld [smem:[#allocation10 + $0x2]] }
 0x1be   :  { %v422_v10 = vadd.f32 %v1566_v12, %v419_v16  ;;  %v519_v44 = vadd.f32 %v1730_v56, %v516_v7  ;;  %v616_v11 = vadd.f32 %v615_v52, %v1890_v50  ;;  %v665_v1 = vstv %s2159_s5  ;;  %v2647_v16 = vld [vmem:[#allocation139_spill] sm:$0xff]  ;;  %v2652_v52 = vld [vmem:[#allocation94_spill] sm:$0xff]  ;;  %s2313_s1 = sld [smem:[#allocation10 + $0x3]] }
 0x1bf   :  { %v472_v20 = vadd.f32 %v1653_v51, %v469_v40  ;;  %v569_v14 = vadd.f32 %v1812_v28, %v566_v0  ;;  %v666_v48 = vadd.f32 %v665_v1, %v1970_v27  ;;  %v715_v31 = vstv %s2169_s27  ;;  %v2648_v7 = vld [vmem:[#allocation83_spill] sm:$0xff]  ;;  %v2651_v0 = vld [vmem:[#allocation74_spill] sm:$0xff]  ;;  %v2655_v1 = vld [vmem:[#allocation84_spill] sm:$0xff]  ;;  %s2319_s8 = sld [smem:[#allocation10 + $0x4]] }
 0x1c0   :  { %v425_v5 = vadd.f32 %v1574_v15, %v422_v10  ;;  %v522_v22 = vadd.f32 %v1733_v60, %v519_v44  ;;  %v619_v42 = vadd.f32 %v1893_v45, %v616_v11  ;;  %v716_v12 = vadd.f32 %v715_v31, %v2045_v25  ;;  %v2650_v40 = vld [vmem:[#allocation127_spill] sm:$0xff]  ;;  %v2653_v10 = vld [vmem:[#allocation116_spill] sm:$0xff]  ;;  %s2329_s4 = sld [smem:[#allocation10 + $0x5]] }
 0x1c1   :  { %v475_v56 = vadd.f32 %v1660_v58, %v472_v20  ;;  %v572_v50 = vadd.f32 %v1815_v21, %v569_v14  ;;  %v669_v54 = vadd.f32 %v1973_v37, %v666_v48  ;;  %v765_v51 = vstv %s2179_s29  ;;  %v2654_v44 = vld [vmem:[#allocation140_spill] sm:$0xff]  ;;  %v2656_v14 = vld [vmem:[#allocation105_spill] sm:$0xff]  ;;  %s2337_s3 = sld [smem:[#allocation10 + $0x6]] }
 0x1c2   :  { %v428_v28 = vadd.f32 %v1581_v18, %v425_v5  ;;  %v525_v27 = vadd.f32 %v1740_v6, %v522_v22  ;;  %v622_v57 = vadd.f32 %v1900_v39, %v619_v42  ;;  %v719_v15 = vadd.f32 %v2052_v26, %v716_v12  ;;  %v2657_v31 = vld [vmem:[#allocation128_spill] sm:$0xff]  ;;  %v2658_v42 = vld [vmem:[#allocation75_spill] sm:$0xff]  ;;  %s1038_s16 = sld [smem:[#allocation10 + $0x7]] }
 0x1c3   :  { %v478_v60 = vadd.f32 %v1663_v59, %v475_v56  ;;  %v575_v45 = vadd.f32 %v1822_v33, %v572_v50  ;;  %v672_v25 = vadd.f32 %v1976_v32, %v669_v54  ;;  %v766_v58 = vadd.f32 %v765_v51, %v2130_v24  ;;  %v2659_v56 = vld [vmem:[#allocation95_spill] sm:$0xff]  ;;  %v2660_v50 = vld [vmem:[#allocation117_spill] sm:$0xff]  ;;  %s2724_s7 = sld [smem:[#allocation153_spill]] }
 0x1c4   :  { %v431_v21 = vadd.f32 %v1584_v19, %v428_v28  ;;  %v528_v37 = vadd.f32 %v1743_v13, %v525_v27  ;;  %v625_v18 = vadd.f32 %v1903_v34, %v622_v57  ;;  %v722_v6 = vadd.f32 %v2055_v49, %v719_v15  ;;  %v2661_v51 = vld [vmem:[#allocation141_spill] sm:$0xff]  ;;  %v2663_v15 = vld [vmem:[#allocation106_spill] sm:$0xff]  ;;  %s2726_s14 = sld [smem:[#allocation154_spill]] }
 0x1c5   :  { %v481_v39 = vadd.f32 %v1670_v62, %v478_v60  ;;  %v578_v26 = vadd.f32 %v1830_v38, %v575_v45  ;;  %v675_v59 = vadd.f32 %v1982_v55, %v672_v25  ;;  %v769_v33 = vadd.f32 %v2133_v29, %v766_v58  ;;  %v2662_v27 = vld [vmem:[#allocation85_spill] sm:$0xff] }
 0x1c6   :  { %v434_v32 = vadd.f32 %v1593_v23, %v431_v21  ;;  %v531_v24 = vadd.f32 %v2645_v8, %v528_v37  ;;  %v628_v19 = vadd.f32 %v2646_v63, %v625_v18  ;;  %v725_v13 = vadd.f32 %v2647_v16, %v722_v6  ;;  %v2664_v45 = vld [vmem:[#allocation129_spill] sm:$0xff]  ;;  %v2665_v21 = vld [vmem:[#allocation76_spill] sm:$0xff]  ;;  %v2667_v6 = vld [vmem:[#allocation118_spill] sm:$0xff] }
 0x1c7   :  { %v484_v34 = vadd.f32 %v2648_v7, %v481_v39  ;;  %v581_v49 = vadd.f32 %v2649_v46, %v578_v26  ;;  %v678_v62 = vadd.f32 %v2650_v40, %v675_v59  ;;  %v772_v38 = vadd.f32 %v2140_v35, %v769_v33  ;;  %v2666_v18 = vld [vmem:[#allocation96_spill] sm:$0xff]  ;;  %v2668_v26 = vld [vmem:[#allocation142_spill] sm:$0xff]  ;;  %v2670_v8 = vld [vmem:[#allocation107_spill] sm:$0xff] }
 0x1c8   :  { %v437_v55 = vadd.f32 %v2651_v0, %v434_v32  ;;  %v534_v29 = vadd.f32 %v2652_v52, %v531_v24  ;;  %v631_v23 = vadd.f32 %v2653_v10, %v628_v19  ;;  %v728_v11 = vadd.f32 %v2654_v44, %v725_v13  ;;  %v2669_v33 = vld [vmem:[#allocation86_spill] sm:$0xff]  ;;  %v2672_v13 = vld [vmem:[#allocation77_spill] sm:$0xff]  ;;  %v2674_v46 = vld [vmem:[#allocation119_spill] sm:$0xff] }
 0x1c9   :  { %v487_v20 = vadd.f32 %v2655_v1, %v484_v34  ;;  %v584_v48 = vadd.f32 %v2656_v14, %v581_v49  ;;  %v681_v5 = vadd.f32 %v2657_v31, %v678_v62  ;;  %v775_v22 = vadd.f32 %v2143_v36, %v772_v38  ;;  %v2671_v63 = vld [vmem:[#allocation130_spill] sm:$0xff]  ;;  %v2673_v34 = vld [vmem:[#allocation97_spill] sm:$0xff]  ;;  %v2675_v40 = vld [vmem:[#allocation143_spill] sm:$0xff] }
 0x1ca   :  { %v440_v12 = vadd.f32 %v2658_v42, %v437_v55  ;;  %v537_v35 = vadd.f32 %v2659_v56, %v534_v29  ;;  %v634_v54 = vadd.f32 %v2660_v50, %v631_v23  ;;  %v731_v28 = vadd.f32 %v2661_v51, %v728_v11  ;;  %v2676_v38 = vld [vmem:[#allocation87_spill] sm:$0xff]  ;;  %v2677_v55 = vld [vmem:[#allocation108_spill] sm:$0xff]  ;;  %v2679_v44 = vld [vmem:[#allocation78_spill] sm:$0xff] }
 0x1cb   :  { %v490_v57 = vadd.f32 %v2662_v27, %v487_v20  ;;  %v587_v60 = vadd.f32 %v2663_v15, %v584_v48  ;;  %v684_v25 = vadd.f32 %v2664_v45, %v681_v5  ;;  %v778_v58 = vadd.f32 %v2150_v47, %v775_v22  ;;  %v2678_v29 = vld [vmem:[#allocation131_spill] sm:$0xff]  ;;  %v2680_v1 = vld [vmem:[#allocation98_spill] sm:$0xff]  ;;  %v2681_v20 = vld [vmem:[#allocation120_spill] sm:$0xff] }
 0x1cc   :  { %v443_v37 = vadd.f32 %v2665_v21, %v440_v12  ;;  %v540_v36 = vadd.f32 %v2666_v18, %v537_v35  ;;  %v637_v39 = vadd.f32 %v2667_v6, %v634_v54  ;;  %v734_v59 = vadd.f32 %v2668_v26, %v731_v28  ;;  %v2682_v48 = vld [vmem:[#allocation144_spill] sm:$0xff]  ;;  %v2684_v42 = vld [vmem:[#allocation109_spill] sm:$0xff]  ;;  %v2686_v54 = vld [vmem:[#allocation79_spill] sm:$0xff] }
 0x1cd   :  { %v493_v32 = vadd.f32 %v2669_v33, %v490_v57  ;;  %v590_v24 = vadd.f32 %v2670_v8, %v587_v60  ;;  %v687_v19 = vadd.f32 %v2671_v63, %v684_v25  ;;  %v781_v16 = vadd.f32 %v2153_v30, %v778_v58  ;;  %v2683_v5 = vld [vmem:[#allocation88_spill] sm:$0xff]  ;;  %v2687_v28 = vld [vmem:[#allocation99_spill] sm:$0xff]  ;;  %v2688_v27 = vld [vmem:[#allocation121_spill] sm:$0xff] }
 0x1ce   :  { %v446_v7 = vadd.f32 %v2672_v13, %v443_v37  ;;  %v543_v47 = vadd.f32 %v2673_v34, %v540_v36  ;;  %v640_v49 = vadd.f32 %v2674_v46, %v637_v39  ;;  %v737_v62 = vadd.f32 %v2675_v40, %v734_v59  ;;  %v2685_v56 = vld [vmem:[#allocation132_spill] sm:$0xff]  ;;  %v2689_v15 = vld [vmem:[#allocation145_spill] sm:$0xff]  ;;  %v2691_v58 = vld [vmem:[#allocation110_spill] sm:$0xff] }
 0x1cf   :  { %v496_v0 = vadd.f32 %v2676_v38, %v493_v32  ;;  %v593_v52 = vadd.f32 %v2677_v55, %v590_v24  ;;  %v690_v10 = vadd.f32 %v2678_v29, %v687_v19  ;;  %v784_v23 = vadd.f32 %v2156_v17, %v781_v16  ;;  %v2690_v45 = vld [vmem:[#allocation89_spill] sm:$0xff]  ;;  %v2693_v36 = vld [vmem:[#allocation152_spill] sm:$0xff]  ;;  %v2696_v33 = vld [vmem:[#allocation122_spill] sm:$0xff] }
 0x1d0   :  { %v449_v11 = vadd.f32 %v2679_v44, %v446_v7  ;;  %v546_v30 = vadd.f32 %v2680_v1, %v543_v47  ;;  %v643_v14 = vadd.f32 %v2681_v20, %v640_v49  ;;  %v740_v31 = vadd.f32 %v2682_v48, %v737_v62  ;;  %v2692_v37 = vld [vmem:[#allocation133_spill] sm:$0xff]  ;;  %v2694_v39 = vld [vmem:[#allocation80_spill] sm:$0xff]  ;;  %v2697_v8 = vld [vmem:[#allocation146_spill] sm:$0xff] }
 0x1d1   :  { %v499_v22 = vadd.f32 %v2683_v5, %v496_v0  ;;  %v596_v12 = vadd.f32 %v2684_v42, %v593_v52  ;;  %v693_v35 = vadd.f32 %v2685_v56, %v690_v10  ;;  %v787_v50 = vadd.f32 %v2162_v41, %v784_v23  ;;  %v2695_v26 = vld [vmem:[#allocation100_spill] sm:$0xff]  ;;  %v2698_v63 = vld [vmem:[#allocation90_spill] sm:$0xff]  ;;  %v2699_v16 = vld [vmem:[#allocation111_spill] sm:$0xff] }
 0x1d2   :  { %v452_v51 = vadd.f32 %v2686_v54, %v449_v11  ;;  %v549_v17 = vadd.f32 %v2687_v28, %v546_v30  ;;  %v646_v57 = vadd.f32 %v2688_v27, %v643_v14  ;;  %v743_v60 = vadd.f32 %v2689_v15, %v740_v31  ;;  %v2700_v7 = vld [vmem:[#allocation134_spill] sm:$0xff]  ;;  %v2701_v46 = vld [vmem:[#allocation81_spill] sm:$0xff]  ;;  %v2703_v38 = vld [vmem:[#allocation123_spill] sm:$0xff] }
 0x1d3   :  { %v502_v25 = vadd.f32 %v2690_v45, %v499_v22  ;;  %v599_v21 = vadd.f32 %v2691_v58, %v596_v12  ;;  %v696_v18 = vadd.f32 %v2692_v37, %v693_v35  ;;  %v790_v6 = vadd.f32 %v2693_v36, %v787_v50  ;;  %v2702_v40 = vld [vmem:[#allocation101_spill] sm:$0xff]  ;;  %v2704_v55 = vld [vmem:[#allocation147_spill] sm:$0xff]  ;;  %v2706_v23 = vld [vmem:[#allocation112_spill] sm:$0xff] }
 0x1d4   :  { %v455_v41 = vadd.f32 %v2694_v39, %v452_v51  ;;  %v552_v59 = vadd.f32 %v2695_v26, %v549_v17  ;;  %v649_v32 = vadd.f32 %v2696_v33, %v646_v57  ;;  %v746_v24 = vadd.f32 %v2697_v8, %v743_v60  ;;  %v2705_v29 = vld [vmem:[#allocation91_spill] sm:$0xff]  ;;  %v2708_v30 = vld [vmem:[#allocation82_spill] sm:$0xff]  ;;  %v2710_v31 = vld [vmem:[#allocation124_spill] sm:$0xff] }
 0x1d5   :  { %v505_v19 = vadd.f32 %v2698_v63, %v502_v25  ;;  %v602_v13 = vadd.f32 %v2699_v16, %v599_v21  ;;  %v699_v34 = vadd.f32 %v2700_v7, %v696_v18  ;;  %v793_v47 = vadd.f32 %v2173_v53, %v790_v6  ;;  %v2707_v11 = vld [vmem:[#allocation135_spill] sm:$0xff]  ;;  %v2709_v14 = vld [vmem:[#allocation102_spill] sm:$0xff]  ;;  %v2711_v22 = vld [vmem:[#allocation148_spill] sm:$0xff] }
 0x1d6   :  { %v458_v49 = vadd.f32 %v2701_v46, %v455_v41  ;;  %v555_v62 = vadd.f32 %v2702_v40, %v552_v59  ;;  %v652_v0 = vadd.f32 %v2703_v38, %v649_v32  ;;  %v749_v52 = vadd.f32 %v2704_v55, %v746_v24  ;;  %v2712_v12 = vld [vmem:[#allocation92_spill] sm:$0xff]  ;;  %v2713_v35 = vld [vmem:[#allocation113_spill] sm:$0xff]  ;;  %v2715_v17 = vld [vmem:[#allocation103_spill] sm:$0xff] }
 0x1d7   :  { %v508_v10 = vadd.f32 %v2705_v29, %v505_v19  ;;  %v605_v44 = vadd.f32 %v2706_v23, %v602_v13  ;;  %v702_v1 = vadd.f32 %v2707_v11, %v699_v34  ;;  %v796_v53 = vadd.f32 %v2176_v9, %v793_v47  ;;  %v2714_v54 = vld [vmem:[#allocation136_spill] sm:$0xff]  ;;  %v2716_v57 = vld [vmem:[#allocation125_spill] sm:$0xff]  ;;  %v2718_v58 = vld [vmem:[#allocation114_spill] sm:$0xff] }
 0x1d8   :  { %v461_v20 = vadd.f32 %v2708_v30, %v458_v49  ;;  %v558_v48 = vadd.f32 %v2709_v14, %v555_v62  ;;  %v655_v5 = vadd.f32 %v2710_v31, %v652_v0  ;;  %v752_v42 = vadd.f32 %v2711_v22, %v749_v52  ;;  %v2717_v60 = vld [vmem:[#allocation149_spill] sm:$0xff]  ;;  %v2720_v6 = vld [vmem:[#allocation126_spill] sm:$0xff]  ;;  %v2723_v13 = vld [vmem:[#allocation151_spill] sm:$0xff] }
 0x1d9   :  { %v511_v56 = vadd.f32 %v2712_v12, %v508_v10  ;;  %v608_v50 = vadd.f32 %v2713_v35, %v605_v44  ;;  %v705_v51 = vadd.f32 %v2714_v54, %v702_v1  ;;  %v799_v28 = vadd.f32 %v2184_v43, %v796_v53  ;;  %v2719_v37 = vld [vmem:[#allocation137_spill] sm:$0xff]  ;;  %v2721_v41 = vld [vmem:[#allocation150_spill] sm:$0xff] }
 0x1da   :  { %v462_v9 = vmax.f32 %v461_v20, 0.0  ;;  %v561_v27 = vadd.f32 %v2715_v17, %v558_v48  ;;  %v658_v15 = vadd.f32 %v2716_v57, %v655_v5  ;;  %v755_v45 = vadd.f32 %v2717_v60, %v752_v42  ;;  %v2722_v32 = vld [vmem:[#allocation138_spill] sm:$0xff] }
 0x1db   :  { %v512_v25 = vmax.f32 %v511_v56, 0.0  ;;  %v611_v21 = vadd.f32 %v2718_v58, %v608_v50  ;;  %v708_v18 = vadd.f32 %v2719_v37, %v705_v51  ;;  %v802_v36 = vadd.f32 %v2190_v61, %v799_v28 }
 0x1dc   :  { %v562_v43 = vmax.f32 %v561_v27, 0.0  ;;  %v661_v39 = vadd.f32 %v2720_v6, %v658_v15  ;;  %v758_v26 = vadd.f32 %v2721_v41, %v755_v45  ;;  %v813_v59 = vstv %s2295_s26 }
 0x1dd   :  { %v612_v33 = vmax.f32 %v611_v21, 0.0  ;;  %v711_v8 = vadd.f32 %v2722_v32, %v708_v18  ;;  %v805_v24 = vadd.f32 %v2193_v2, %v802_v36  ;;  %v814_v63 = vmul.f32 %v813_v59, %v462_v9 }
 0x1de   :  { %v662_v19 = vmax.f32 %v661_v39, 0.0  ;;  %v817_v61 = vstv %s2301_s15  ;;  %v820_v16 = vstv %s2307_s9  ;;  %v761_v7 = vadd.f32 %v2723_v13, %v758_v26 }
 0x1df   :  { %v808_v34 = vadd.f32 %v2199_v3, %v805_v24  ;;  %v2725_v47 = vstv %s2724_s7  ;;  %v818_v49 = vmul.f32 %v817_v61, %v512_v25  ;;  %v821_v40 = vmul.f32 %v820_v16, %v562_v43 }
 0x1e0   :  { %v816_v46 = vadd.f32 %v2725_v47, %v814_v63  ;;  %v823_v62 = vstv %s2313_s1  ;;  %v826_v2 = vstv %s2319_s8  ;;  %v712_v38 = vmax.f32 %v711_v8, 0.0 }
 0x1e1   :  { %v811_v0 = vadd.f32 %v2205_v4, %v808_v34  ;;  %v824_v52 = vmul.f32 %v823_v62, %v612_v33  ;;  %v829_v29 = vstv %s2329_s4  ;;  %v762_v10 = vmax.f32 %v761_v7, 0.0 }
 0x1e2   :  { %v819_v55 = vadd.f32 %v818_v49, %v816_v46  ;;  %v827_v44 = vmul.f32 %v826_v2, %v662_v19  ;;  %v832_v11 = vstv %s2337_s3  ;;  %v830_v53 = vmul.f32 %v829_v29, %v712_v38 }
 0x1e3   :  { %v812_v3 = vmax.f32 %v811_v0, 0.0  ;;  %v835_v30 = vstv %s1038_s16  ;;  %v833_v14 = vmul.f32 %v832_v11, %v762_v10 }
 0x1e4   :  { %v822_v23 = vadd.f32 %v821_v40, %v819_v55 }
 0x1e5   :  { %v836_v31 = vmul.f32 %v835_v30, %v812_v3 }
 0x1e6   :  { %v825_v1 = vadd.f32 %v824_v52, %v822_v23 }
 0x1e8   :  { %v828_v20 = vadd.f32 %v827_v44, %v825_v1 }
 0x1ea   :  { %v831_v48 = vadd.f32 %v830_v53, %v828_v20 }
 0x1ec   :  { %v834_v5 = vadd.f32 %v833_v14, %v831_v48 }
 0x1ee   :  { %v837_v22 = vadd.f32 %v836_v31, %v834_v5 }
 0x1f0   :  { %v838_v42 = vsub.f32 0.0, %v837_v22 }
 0x1f2   :  { %v839_v12 = vmul.f32 1.442695, %v838_v42 }
 0x1f4   :  { %1047 = vpow2.f32 %v839_v12 }
 0x201   :  { %v1048_v4 = vpop.eup %1047 }
 0x202   :  { %v841_v56 = vadd.f32 1.0, %v1048_v4 }
 0x204   :  { %1049 = vrcp.f32 %v841_v56 }
 0x211   :  { %v1050_v35 = vpop.eup %1049 }
 0x212   :  { %843 = vst [vmem:[%s2726_s14] sm:$0xff] %v1050_v35 }
 0x213   :  { %848 = vsyncpa [#allocation4], 1 }
 0x214   :  { %849 = vsyncpa [#allocation6], 1 }
 0x215   :  { %850 = vsyncpa [#allocation9], 1 }

</bundles_post_ra>
